<compile_context>
chip_gen: v7x
topology: tpu7x:2x2x1
jax: 0.10.0
libtpu: 0.0.40
codegen_flags: <defaults>
</compile_context>

<pallas_src>
from functools import partial

import jax
import jax.numpy as jnp
from jax import lax
from jax.experimental import pallas as pl
from jax.experimental.pallas import tpu as pltpu

LN_EPS = 1e-5        # nn.LayerNorm default
NEG_MASK = -1e9      # finite "minus infinity" for additive attention masks


def _round_up(n, m):
    return ((n + m - 1) // m) * m


def _layernorm_padded(x, gamma, beta, inv_n):
    """LayerNorm over the real (unpadded) feature width.

    Relies on: padded feature columns of `x` are exactly zero and gamma/beta are
    zero-padded, so sums over the padded width equal sums over the real width
    and padded output columns come out exactly zero.
    """
    mu = jnp.sum(x, axis=-1, keepdims=True) * inv_n
    ex2 = jnp.sum(x * x, axis=-1, keepdims=True) * inv_n
    var = ex2 - mu * mu
    return (x - mu) * jax.lax.rsqrt(var + LN_EPS) * gamma + beta


def block_kernel(
    x_ref, mask_ref,
    ln1_g_ref, ln1_b_ref,
    wqkv_ref, bqkv_ref,
    wo_ref, bo_ref,
    ln2_g_ref, ln2_b_ref,
    w1_ref, b1_ref, w2_ref, b2_ref,
    out_ref, *, n_heads, d_head, hd_pad, e_real,
):
    b_blk, s_pad, e_pad = x_ref.shape
    rows = b_blk * s_pad
    x = x_ref[...].reshape(rows, e_pad)        # (R, E_pad) f32, b_blk batch elems
    inv_n = 1.0 / e_real
    mask = mask_ref[...]                       # (R, R) finite additive mask, f32
                                               # (block-diagonal across batch elems)

    # ---- ln1 + fused QKV projection (1/sqrt(D) already folded into Wq/bq) ----
    ln1x = _layernorm_padded(x, ln1_g_ref[...], ln1_b_ref[...], inv_n)
    qkv = jnp.dot(ln1x.astype(jnp.bfloat16), wqkv_ref[...],
                  preferred_element_type=jnp.float32) + bqkv_ref[...]
    qkv = qkv.astype(jnp.bfloat16)             # (R, 3*hd_pad)

    q = qkv[:, :hd_pad]
    k = qkv[:, hd_pad:2 * hd_pad]
    v = qkv[:, 2 * hd_pad:3 * hd_pad]

    # ---- per-head attention; heads stay packed (D-wide lane slices) ----
    ctx_parts = []
    for h in range(n_heads):
        lo, hi = h * d_head, (h + 1) * d_head
        q_h, k_h, v_h = q[:, lo:hi], k[:, lo:hi], v[:, lo:hi]

        # q @ k^T  (rhs-transposed dimension numbers)
        s_h = lax.dot_general(q_h, k_h, (((1,), (1,)), ((), ())),
                              preferred_element_type=jnp.float32)     # (R, R)
        s_h = s_h + mask
        m = jnp.max(s_h, axis=-1, keepdims=True)
        p = jnp.exp(s_h - m)
        denom = jnp.sum(p, axis=-1, keepdims=True)
        a_h = (p * pl.reciprocal(denom, approx=True)).astype(jnp.bfloat16)
        # (attention-weight dropout omitted: inference mode)
        ctx_parts.append(jnp.dot(a_h, v_h, preferred_element_type=jnp.float32))

    hd = n_heads * d_head
    if hd_pad > hd:
        ctx_parts.append(jnp.zeros((rows, hd_pad - hd), jnp.float32))
    ctx = jnp.concatenate(ctx_parts, axis=-1).astype(jnp.bfloat16)     # (R, hd_pad)

    # ---- single out-projection matmul over all heads ----
    attn_out = jnp.dot(ctx, wo_ref[...],
                       preferred_element_type=jnp.float32) + bo_ref[...]

    # ---- first residual (drop1 ≡ identity) ----
    x1 = x + attn_out

    # ---- ln2 + feed-forward + second residual (drop2 / FF dropout ≡ identity) ----
    ln2x = _layernorm_padded(x1, ln2_g_ref[...], ln2_b_ref[...], inv_n)
    h1 = jnp.dot(ln2x.astype(jnp.bfloat16), w1_ref[...],
                 preferred_element_type=jnp.float32) + b1_ref[...]
    h1 = jnp.maximum(h1, 0.0).astype(jnp.bfloat16)
    ffo = jnp.dot(h1, w2_ref[...], preferred_element_type=jnp.float32) + b2_ref[...]

    out_ref[...] = (x1 + ffo).reshape(b_blk, s_pad, e_pad)


def prepare_kernel_params(p, n_heads):
    """One-time transform of logical (PyTorch-layout) f32 params into the padded,
    fused, bf16 layout consumed by the kernel.  Heads remain packed (no per-head
    lane padding): the QKV output width is H*D rounded up to a 128 multiple."""
    E = p["wq_t"].shape[0]
    F = p["w1_t"].shape[1]
    assert E % n_heads == 0
    D = E // n_heads
    hd = E                          # packed head width (H * D)
    hd_pad = _round_up(hd, 128)
    e_pad = _round_up(E, 128)
    f_pad = _round_up(F, 128)
    scale = 1.0 / float(D) ** 0.5

    def pad2(w, r, c):
        return jnp.pad(w, ((0, r - w.shape[0]), (0, c - w.shape[1])))

    def pad_vec(b, n):
        return jnp.pad(b, (0, n - b.shape[0]))[None, :]

    wq = pad2(p["wq_t"] * scale, e_pad, hd_pad)
    wk = pad2(p["wk_t"], e_pad, hd_pad)
    wv = pad2(p["wv_t"], e_pad, hd_pad)
    wqkv = jnp.concatenate([wq, wk, wv], axis=1)                 # (e_pad, 3*hd_pad)
    bqkv = jnp.concatenate([pad_vec(p["bq"] * scale, hd_pad),
                            pad_vec(p["bk"], hd_pad),
                            pad_vec(p["bv"], hd_pad)], axis=1)   # (1, 3*hd_pad)

    wo = pad2(p["wo_t"], hd_pad, e_pad)       # (hd_pad, e_pad): packed ctx rows
    w1 = pad2(p["w1_t"], e_pad, f_pad)
    w2 = pad2(p["w2_t"], f_pad, e_pad)

    return {
        "ln1_g": pad_vec(p["ln1_g"], e_pad), "ln1_b": pad_vec(p["ln1_b"], e_pad),
        "wqkv_t": wqkv.astype(jnp.bfloat16), "bqkv": bqkv,
        "wo_t": wo.astype(jnp.bfloat16), "bo": pad_vec(p["bo"], e_pad),
        "ln2_g": pad_vec(p["ln2_g"], e_pad), "ln2_b": pad_vec(p["ln2_b"], e_pad),
        "w1_t": w1.astype(jnp.bfloat16), "b1": pad_vec(p["b1"], f_pad),
        "w2_t": w2.astype(jnp.bfloat16), "b2": pad_vec(p["b2"], e_pad),
        "e_pad": e_pad, "hd_pad": hd_pad, "d_head": D,
    }


def prepare_mask(mask, s_pad, b_blk):
    """One-time mask prep (hoisted out of the per-call wrapper):
      * -inf -> finite -1e9;
      * padded key columns masked for real queries, padded query rows kept
        finite (their outputs are discarded);
      * replicated block-diagonally so b_blk batch elements folded into one row
        slab cannot attend across each other."""
    S = mask.shape[0]
    mask_f = jnp.where(jnp.isfinite(mask), mask, NEG_MASK).astype(jnp.float32)
    m = jnp.full((s_pad, s_pad), NEG_MASK, dtype=jnp.float32)
    m = m.at[:S, :S].set(mask_f)
    m = m.at[S:, :].set(0.0)
    if b_blk == 1:
        return m
    rows = b_blk * s_pad
    big = jnp.full((rows, rows), NEG_MASK, dtype=jnp.float32)
    for b in range(b_blk):
        sl = slice(b * s_pad, (b + 1) * s_pad)
        big = big.at[sl, sl].set(m)
    return big


def block_forward(x, mask_pad, kparams, n_heads, b_blk=1):
    """Run the Pallas Block kernel.

    `kparams` comes from prepare_kernel_params; `mask_pad` from prepare_mask
    (built once, since it depends only on S and b_blk).  `b_blk` batch elements
    are processed per grid step; keep grid >= 2 on v7x so both TCs get work."""
    B, S, E = x.shape
    e_pad = kparams["e_pad"]
    hd_pad = kparams["hd_pad"]
    d_head = kparams["d_head"]
    s_pad = _round_up(max(S, 8), 8)
    assert B % b_blk == 0
    assert mask_pad.shape == (b_blk * s_pad, b_blk * s_pad)

    # Lane/sublane-dense padding (layout plumbing only; sliced back below).
    x_pad = jnp.pad(x, ((0, 0), (0, s_pad - S), (0, e_pad - E)))

    weights = [
        mask_pad,
        kparams["ln1_g"], kparams["ln1_b"],
        kparams["wqkv_t"], kparams["bqkv"],
        kparams["wo_t"], kparams["bo"],
        kparams["ln2_g"], kparams["ln2_b"],
        kparams["w1_t"], kparams["b1"],
        kparams["w2_t"], kparams["b2"],
    ]

    def full_spec(a):
        nd = a.ndim
        return pl.BlockSpec(a.shape, lambda b, _nd=nd: (0,) * _nd)

    in_specs = [pl.BlockSpec((b_blk, s_pad, e_pad), lambda b: (b, 0, 0))]
    in_specs += [full_spec(w) for w in weights]
    out_specs = pl.BlockSpec((b_blk, s_pad, e_pad), lambda b: (b, 0, 0))

    out = pl.pallas_call(
        partial(block_kernel, n_heads=n_heads, d_head=d_head,
                hd_pad=hd_pad, e_real=E),
        out_shape=jax.ShapeDtypeStruct((B, s_pad, e_pad), jnp.float32),
        grid_spec=pltpu.PrefetchScalarGridSpec(
            num_scalar_prefetch=0,
            grid=(B // b_blk,),
            in_specs=in_specs,
            out_specs=out_specs,
        ),
        compiler_params=pltpu.CompilerParams(dimension_semantics=("parallel",)),
    )(x_pad, *weights)

    return out[:, :S, :E]


# ---------------------------------------------------------------------------
# Pure-JAX reference (f32, PyTorch semantics) for a correctness cross-check.
# ---------------------------------------------------------------------------
def block_reference(x, mask, p, n_heads):
    B, S, E = x.shape
    D = E // n_heads
    scale = 1.0 / jnp.sqrt(jnp.float32(D))

    def ln(t, g, b):
        mu = jnp.mean(t, axis=-1, keepdims=True)
        var = jnp.mean((t - mu) ** 2, axis=-1, keepdims=True)
        return (t - mu) * jax.lax.rsqrt(var + LN_EPS) * g + b

    ln1x = ln(x, p["ln1_g"], p["ln1_b"])
    q = ln1x @ p["wq_t"] + p["bq"]
    k = ln1x @ p["wk_t"] + p["bk"]
    v = ln1x @ p["wv_t"] + p["bv"]
    qh = q.reshape(B, S, n_heads, D).transpose(0, 2, 1, 3) * scale
    kh = k.reshape(B, S, n_heads, D).transpose(0, 2, 1, 3)
    vh = v.reshape(B, S, n_heads, D).transpose(0, 2, 1, 3)
    scores = jnp.einsum("bhqd,bhkd->bhqk", qh, kh) + mask[None, None]
    attn = jax.nn.softmax(scores, axis=-1)
    ctx = jnp.einsum("bhqk,bhkd->bhqd", attn, vh)
    ctx = ctx.transpose(0, 2, 1, 3).reshape(B, S, E)
    attn_out = ctx @ p["wo_t"] + p["bo"]
    x1 = x + attn_out
    ln2x = ln(x1, p["ln2_g"], p["ln2_b"])
    h = jnp.maximum(ln2x @ p["w1_t"] + p["b1"], 0.0)
    ffo = h @ p["w2_t"] + p["b2"]
    return x1 + ffo


def subsequent_mask(sz):
    # Matches the PyTorch helper: tril of ones; zeros above the diagonal become
    # -inf.  (The +1.0 on allowed positions is a per-row constant, so softmax is
    # unchanged; prepare_mask converts -inf to a finite -1e9.)
    tri = jnp.tril(jnp.ones((sz, sz), dtype=jnp.float32))
    return jnp.where(tri == 0, -jnp.inf, tri)


def make_params(key, n_features):
    E = n_features
    keys = jax.random.split(key, 8)
    std = 0.02

    def w(k, shape):
        return (std * jax.random.normal(k, shape)).astype(jnp.float32)

    return {
        "ln1_g": jnp.ones((E,), jnp.float32),
        "ln1_b": jnp.zeros((E,), jnp.float32),
        # in_proj (3E, E) split into q/k/v, stored transposed as (E, E)
        "wq_t": w(keys[0], (E, E)),
        "wk_t": w(keys[1], (E, E)),
        "wv_t": w(keys[2], (E, E)),
        "bq": jnp.zeros((E,), jnp.float32),
        "bk": jnp.zeros((E,), jnp.float32),
        "bv": jnp.zeros((E,), jnp.float32),
        # out_proj (E, E) stored transposed
        "wo_t": w(keys[3], (E, E)),
        "bo": jnp.zeros((E,), jnp.float32),
        "ln2_g": jnp.ones((E,), jnp.float32),
        "ln2_b": jnp.zeros((E,), jnp.float32),
        # feed-forward: Linear(E, 4E) then Linear(4E, E), stored transposed
        "w1_t": w(keys[4], (E, 4 * E)),
        "b1": w(keys[5], (4 * E,)),
        "w2_t": w(keys[6], (4 * E, E)),
        "b2": w(keys[7], (E,)),
    }


if __name__ == "__main__":
    # Small shapes consistent with the module (n_features divisible by n_heads=6).
    B, S, E, H = 2, 10, 96, 6

    key = jax.random.PRNGKey(0)
    kx, kp = jax.random.split(key)
    x = jax.random.normal(kx, (B, S, E), dtype=jnp.float32)
    params = make_params(kp, E)
    mask = subsequent_mask(S)

    kparams = prepare_kernel_params(params, H)     # one-time param transform
    s_pad = _round_up(max(S, 8), 8)
    # Keep >= 2 "parallel" grid steps so both v7x TensorCores get work; for
    # larger B this folds multiple batch elements per step (fatter MXU rows and
    # fewer fixed per-step overheads on single-TC v5e/v6e as well).
    b_blk = B // 2 if (B >= 2 and B % 2 == 0) else 1
    mask_pad = prepare_mask(mask, s_pad, b_blk)    # one-time mask prep (hoisted)

    out = jax.block_until_ready(block_forward(x, mask_pad, kparams, H, b_blk=b_blk))
    ref = jax.block_until_ready(block_reference(x, mask, params, H))

    assert out.shape == (B, S, E)
    max_err = float(jnp.max(jnp.abs(out - ref)))
    assert jnp.allclose(out, ref, rtol=2e-2, atol=2e-2), (
        f"mismatch vs pure-JAX reference (max abs err {max_err})")

    print("KERNEL_OK")
</pallas_src>

<mosaic_0001>
module attributes {stable_mosaic.version = 11 : i64} {
  func.func @block_kernel(%arg0: i32, %arg1: memref<1x16x128xf32, #tpu.memory_space<vmem>>, %arg2: memref<16x16xf32, #tpu.memory_space<vmem>>, %arg3: memref<1x128xf32, #tpu.memory_space<vmem>>, %arg4: memref<1x128xf32, #tpu.memory_space<vmem>>, %arg5: memref<128x384xbf16, #tpu.memory_space<vmem>>, %arg6: memref<1x384xf32, #tpu.memory_space<vmem>>, %arg7: memref<128x128xbf16, #tpu.memory_space<vmem>>, %arg8: memref<1x128xf32, #tpu.memory_space<vmem>>, %arg9: memref<1x128xf32, #tpu.memory_space<vmem>>, %arg10: memref<1x128xf32, #tpu.memory_space<vmem>>, %arg11: memref<128x384xbf16, #tpu.memory_space<vmem>>, %arg12: memref<1x384xf32, #tpu.memory_space<vmem>>, %arg13: memref<384x128xbf16, #tpu.memory_space<vmem>>, %arg14: memref<1x128xf32, #tpu.memory_space<vmem>>, %arg15: memref<1x16x128xf32, #tpu.memory_space<vmem>>) attributes {dimension_semantics = [#tpu.dimension_semantics<parallel>], iteration_bounds = array<i64: 2>, scalar_prefetch = 0 : i64, scratch_operands = 0 : i64, tpu.core_type = #tpu.core_type<tc>, window_params = [{transform_indices = @transform_0, window_bounds = array<i64: 1, 16, 128>}, {pipeline_mode = #tpu.pipeline_mode<synchronous>, transform_indices = @transform_1, window_bounds = array<i64: 16, 16>}, {pipeline_mode = #tpu.pipeline_mode<synchronous>, transform_indices = @transform_2, window_bounds = array<i64: 1, 128>}, {pipeline_mode = #tpu.pipeline_mode<synchronous>, transform_indices = @transform_3, window_bounds = array<i64: 1, 128>}, {pipeline_mode = #tpu.pipeline_mode<synchronous>, transform_indices = @transform_4, window_bounds = array<i64: 128, 384>}, {pipeline_mode = #tpu.pipeline_mode<synchronous>, transform_indices = @transform_5, window_bounds = array<i64: 1, 384>}, {pipeline_mode = #tpu.pipeline_mode<synchronous>, transform_indices = @transform_6, window_bounds = array<i64: 128, 128>}, {pipeline_mode = #tpu.pipeline_mode<synchronous>, transform_indices = @transform_7, window_bounds = array<i64: 1, 128>}, {pipeline_mode = #tpu.pipeline_mode<synchronous>, transform_indices = @transform_8, window_bounds = array<i64: 1, 128>}, {pipeline_mode = #tpu.pipeline_mode<synchronous>, transform_indices = @transform_9, window_bounds = array<i64: 1, 128>}, {pipeline_mode = #tpu.pipeline_mode<synchronous>, transform_indices = @transform_10, window_bounds = array<i64: 128, 384>}, {pipeline_mode = #tpu.pipeline_mode<synchronous>, transform_indices = @transform_11, window_bounds = array<i64: 1, 384>}, {pipeline_mode = #tpu.pipeline_mode<synchronous>, transform_indices = @transform_12, window_bounds = array<i64: 384, 128>}, {pipeline_mode = #tpu.pipeline_mode<synchronous>, transform_indices = @transform_13, window_bounds = array<i64: 1, 128>}, {transform_indices = @transform_14, window_bounds = array<i64: 1, 16, 128>}]} {
    %c0 = arith.constant 0 : index
    %c0_0 = arith.constant 0 : index
    %c0_1 = arith.constant 0 : index
    %0 = vector.load %arg1[%c0, %c0_0, %c0_1] : memref<1x16x128xf32, #tpu.memory_space<vmem>>, vector<1x16x128xf32>
    %1 = vector.shape_cast %0 : vector<1x16x128xf32> to vector<16x128xf32>
    %c0_2 = arith.constant 0 : index
    %c0_3 = arith.constant 0 : index
    %2 = vector.load %arg2[%c0_2, %c0_3] : memref<16x16xf32, #tpu.memory_space<vmem>>, vector<16x16xf32>
    %c0_4 = arith.constant 0 : index
    %c0_5 = arith.constant 0 : index
    %3 = vector.load %arg3[%c0_4, %c0_5] : memref<1x128xf32, #tpu.memory_space<vmem>>, vector<1x128xf32>
    %c0_6 = arith.constant 0 : index
    %c0_7 = arith.constant 0 : index
    %4 = vector.load %arg4[%c0_6, %c0_7] : memref<1x128xf32, #tpu.memory_space<vmem>>, vector<1x128xf32>
    %cst = arith.constant dense<0.000000e+00> : vector<16xf32>
    %5 = vector.multi_reduction <add>, %1, %cst [1] : vector<16x128xf32> to vector<16xf32>
    %6 = vector.shape_cast %5 : vector<16xf32> to vector<16x1xf32>
    %cst_8 = arith.constant 0.010416667 : f32
    %7 = vector.broadcast %cst_8 : f32 to vector<16x1xf32>
    %8 = arith.mulf %6, %7 : vector<16x1xf32>
    %9 = arith.mulf %1, %1 : vector<16x128xf32>
    %cst_9 = arith.constant dense<0.000000e+00> : vector<16xf32>
    %10 = vector.multi_reduction <add>, %9, %cst_9 [1] : vector<16x128xf32> to vector<16xf32>
    %11 = vector.shape_cast %10 : vector<16xf32> to vector<16x1xf32>
    %cst_10 = arith.constant 0.010416667 : f32
    %12 = vector.broadcast %cst_10 : f32 to vector<16x1xf32>
    %13 = arith.mulf %11, %12 : vector<16x1xf32>
    %14 = arith.mulf %8, %8 : vector<16x1xf32>
    %15 = arith.subf %13, %14 : vector<16x1xf32>
    %16 = vector.broadcast %8 : vector<16x1xf32> to vector<16x128xf32>
    %17 = arith.subf %1, %16 : vector<16x128xf32>
    %cst_11 = arith.constant 9.99999974E-6 : f32
    %18 = vector.broadcast %cst_11 : f32 to vector<16x1xf32>
    %19 = arith.addf %15, %18 : vector<16x1xf32>
    %20 = math.rsqrt %19 : vector<16x1xf32>
    %21 = vector.broadcast %20 : vector<16x1xf32> to vector<16x128xf32>
    %22 = arith.mulf %17, %21 : vector<16x128xf32>
    %23 = vector.broadcast %3 : vector<1x128xf32> to vector<16x128xf32>
    %24 = arith.mulf %22, %23 : vector<16x128xf32>
    %25 = vector.broadcast %4 : vector<1x128xf32> to vector<16x128xf32>
    %26 = arith.addf %24, %25 : vector<16x128xf32>
    %27 = arith.truncf %26 : vector<16x128xf32> to vector<16x128xbf16>
    %c0_12 = arith.constant 0 : index
    %c0_13 = arith.constant 0 : index
    %28 = vector.load %arg5[%c0_12, %c0_13] : memref<128x384xbf16, #tpu.memory_space<vmem>>, vector<128x384xbf16>
    %cst_14 = arith.constant dense<0.000000e+00> : vector<16x384xf32>
    %29 = tpu.matmul %27, %28, %cst_14 {dimension_numbers = #tpu.dot_dimension_numbers<[1], [0], [0], [1], [0, 0, 1, 1], [], []>} : vector<16x128xbf16>, vector<128x384xbf16>, vector<16x384xf32> -> vector<16x384xf32>
    %c0_15 = arith.constant 0 : index
    %c0_16 = arith.constant 0 : index
    %30 = vector.load %arg6[%c0_15, %c0_16] : memref<1x384xf32, #tpu.memory_space<vmem>>, vector<1x384xf32>
    %31 = vector.broadcast %30 : vector<1x384xf32> to vector<16x384xf32>
    %32 = arith.addf %29, %31 : vector<16x384xf32>
    %33 = arith.truncf %32 : vector<16x384xf32> to vector<16x384xbf16>
    %34 = vector.extract_strided_slice %33 {offsets = [0, 0], sizes = [16, 128], strides = [1, 1]} : vector<16x384xbf16> to vector<16x128xbf16>
    %35 = vector.extract_strided_slice %33 {offsets = [0, 128], sizes = [16, 128], strides = [1, 1]} : vector<16x384xbf16> to vector<16x128xbf16>
    %36 = vector.extract_strided_slice %33 {offsets = [0, 256], sizes = [16, 128], strides = [1, 1]} : vector<16x384xbf16> to vector<16x128xbf16>
    %37 = vector.extract_strided_slice %34 {offsets = [0, 0], sizes = [16, 16], strides = [1, 1]} : vector<16x128xbf16> to vector<16x16xbf16>
    %38 = vector.extract_strided_slice %35 {offsets = [0, 0], sizes = [16, 16], strides = [1, 1]} : vector<16x128xbf16> to vector<16x16xbf16>
    %39 = vector.extract_strided_slice %36 {offsets = [0, 0], sizes = [16, 16], strides = [1, 1]} : vector<16x128xbf16> to vector<16x16xbf16>
    %cst_17 = arith.constant dense<0.000000e+00> : vector<16x16xf32>
    %40 = tpu.matmul %37, %38, %cst_17 {dimension_numbers = #tpu.dot_dimension_numbers<[1], [1], [0], [0], [0, 0, 1, 0], [], []>} : vector<16x16xbf16>, vector<16x16xbf16>, vector<16x16xf32> -> vector<16x16xf32>
    %41 = arith.addf %40, %2 : vector<16x16xf32>
    %cst_18 = arith.constant dense<0xFF800000> : vector<16xf32>
    %42 = vector.multi_reduction <maximumf>, %41, %cst_18 [1] : vector<16x16xf32> to vector<16xf32>
    %43 = vector.shape_cast %42 : vector<16xf32> to vector<16x1xf32>
    %44 = vector.broadcast %43 : vector<16x1xf32> to vector<16x16xf32>
    %45 = arith.subf %41, %44 : vector<16x16xf32>
    %46 = math.exp %45 : vector<16x16xf32>
    %cst_19 = arith.constant dense<0.000000e+00> : vector<16xf32>
    %47 = vector.multi_reduction <add>, %46, %cst_19 [1] : vector<16x16xf32> to vector<16xf32>
    %48 = vector.shape_cast %47 : vector<16xf32> to vector<16x1xf32>
    %49 = tpu.reciprocal %48 {approx = true} : vector<16x1xf32> -> vector<16x1xf32>
    %50 = vector.broadcast %49 : vector<16x1xf32> to vector<16x16xf32>
    %51 = arith.mulf %46, %50 : vector<16x16xf32>
    %52 = arith.truncf %51 : vector<16x16xf32> to vector<16x16xbf16>
    %cst_20 = arith.constant dense<0.000000e+00> : vector<16x16xf32>
    %53 = tpu.matmul %52, %39, %cst_20 {dimension_numbers = #tpu.dot_dimension_numbers<[1], [0], [0], [1], [0, 0, 1, 1], [], []>} : vector<16x16xbf16>, vector<16x16xbf16>, vector<16x16xf32> -> vector<16x16xf32>
    %54 = vector.extract_strided_slice %34 {offsets = [0, 16], sizes = [16, 16], strides = [1, 1]} : vector<16x128xbf16> to vector<16x16xbf16>
    %55 = vector.extract_strided_slice %35 {offsets = [0, 16], sizes = [16, 16], strides = [1, 1]} : vector<16x128xbf16> to vector<16x16xbf16>
    %56 = vector.extract_strided_slice %36 {offsets = [0, 16], sizes = [16, 16], strides = [1, 1]} : vector<16x128xbf16> to vector<16x16xbf16>
    %cst_21 = arith.constant dense<0.000000e+00> : vector<16x16xf32>
    %57 = tpu.matmul %54, %55, %cst_21 {dimension_numbers = #tpu.dot_dimension_numbers<[1], [1], [0], [0], [0, 0, 1, 0], [], []>} : vector<16x16xbf16>, vector<16x16xbf16>, vector<16x16xf32> -> vector<16x16xf32>
    %58 = arith.addf %57, %2 : vector<16x16xf32>
    %cst_22 = arith.constant dense<0xFF800000> : vector<16xf32>
    %59 = vector.multi_reduction <maximumf>, %58, %cst_22 [1] : vector<16x16xf32> to vector<16xf32>
    %60 = vector.shape_cast %59 : vector<16xf32> to vector<16x1xf32>
    %61 = vector.broadcast %60 : vector<16x1xf32> to vector<16x16xf32>
    %62 = arith.subf %58, %61 : vector<16x16xf32>
    %63 = math.exp %62 : vector<16x16xf32>
    %cst_23 = arith.constant dense<0.000000e+00> : vector<16xf32>
    %64 = vector.multi_reduction <add>, %63, %cst_23 [1] : vector<16x16xf32> to vector<16xf32>
    %65 = vector.shape_cast %64 : vector<16xf32> to vector<16x1xf32>
    %66 = tpu.reciprocal %65 {approx = true} : vector<16x1xf32> -> vector<16x1xf32>
    %67 = vector.broadcast %66 : vector<16x1xf32> to vector<16x16xf32>
    %68 = arith.mulf %63, %67 : vector<16x16xf32>
    %69 = arith.truncf %68 : vector<16x16xf32> to vector<16x16xbf16>
    %cst_24 = arith.constant dense<0.000000e+00> : vector<16x16xf32>
    %70 = tpu.matmul %69, %56, %cst_24 {dimension_numbers = #tpu.dot_dimension_numbers<[1], [0], [0], [1], [0, 0, 1, 1], [], []>} : vector<16x16xbf16>, vector<16x16xbf16>, vector<16x16xf32> -> vector<16x16xf32>
    %71 = vector.extract_strided_slice %34 {offsets = [0, 32], sizes = [16, 16], strides = [1, 1]} : vector<16x128xbf16> to vector<16x16xbf16>
    %72 = vector.extract_strided_slice %35 {offsets = [0, 32], sizes = [16, 16], strides = [1, 1]} : vector<16x128xbf16> to vector<16x16xbf16>
    %73 = vector.extract_strided_slice %36 {offsets = [0, 32], sizes = [16, 16], strides = [1, 1]} : vector<16x128xbf16> to vector<16x16xbf16>
    %cst_25 = arith.constant dense<0.000000e+00> : vector<16x16xf32>
    %74 = tpu.matmul %71, %72, %cst_25 {dimension_numbers = #tpu.dot_dimension_numbers<[1], [1], [0], [0], [0, 0, 1, 0], [], []>} : vector<16x16xbf16>, vector<16x16xbf16>, vector<16x16xf32> -> vector<16x16xf32>
    %75 = arith.addf %74, %2 : vector<16x16xf32>
    %cst_26 = arith.constant dense<0xFF800000> : vector<16xf32>
    %76 = vector.multi_reduction <maximumf>, %75, %cst_26 [1] : vector<16x16xf32> to vector<16xf32>
    %77 = vector.shape_cast %76 : vector<16xf32> to vector<16x1xf32>
    %78 = vector.broadcast %77 : vector<16x1xf32> to vector<16x16xf32>
    %79 = arith.subf %75, %78 : vector<16x16xf32>
    %80 = math.exp %79 : vector<16x16xf32>
    %cst_27 = arith.constant dense<0.000000e+00> : vector<16xf32>
    %81 = vector.multi_reduction <add>, %80, %cst_27 [1] : vector<16x16xf32> to vector<16xf32>
    %82 = vector.shape_cast %81 : vector<16xf32> to vector<16x1xf32>
    %83 = tpu.reciprocal %82 {approx = true} : vector<16x1xf32> -> vector<16x1xf32>
    %84 = vector.broadcast %83 : vector<16x1xf32> to vector<16x16xf32>
    %85 = arith.mulf %80, %84 : vector<16x16xf32>
    %86 = arith.truncf %85 : vector<16x16xf32> to vector<16x16xbf16>
    %cst_28 = arith.constant dense<0.000000e+00> : vector<16x16xf32>
    %87 = tpu.matmul %86, %73, %cst_28 {dimension_numbers = #tpu.dot_dimension_numbers<[1], [0], [0], [1], [0, 0, 1, 1], [], []>} : vector<16x16xbf16>, vector<16x16xbf16>, vector<16x16xf32> -> vector<16x16xf32>
    %88 = vector.extract_strided_slice %34 {offsets = [0, 48], sizes = [16, 16], strides = [1, 1]} : vector<16x128xbf16> to vector<16x16xbf16>
    %89 = vector.extract_strided_slice %35 {offsets = [0, 48], sizes = [16, 16], strides = [1, 1]} : vector<16x128xbf16> to vector<16x16xbf16>
    %90 = vector.extract_strided_slice %36 {offsets = [0, 48], sizes = [16, 16], strides = [1, 1]} : vector<16x128xbf16> to vector<16x16xbf16>
    %cst_29 = arith.constant dense<0.000000e+00> : vector<16x16xf32>
    %91 = tpu.matmul %88, %89, %cst_29 {dimension_numbers = #tpu.dot_dimension_numbers<[1], [1], [0], [0], [0, 0, 1, 0], [], []>} : vector<16x16xbf16>, vector<16x16xbf16>, vector<16x16xf32> -> vector<16x16xf32>
    %92 = arith.addf %91, %2 : vector<16x16xf32>
    %cst_30 = arith.constant dense<0xFF800000> : vector<16xf32>
    %93 = vector.multi_reduction <maximumf>, %92, %cst_30 [1] : vector<16x16xf32> to vector<16xf32>
    %94 = vector.shape_cast %93 : vector<16xf32> to vector<16x1xf32>
    %95 = vector.broadcast %94 : vector<16x1xf32> to vector<16x16xf32>
    %96 = arith.subf %92, %95 : vector<16x16xf32>
    %97 = math.exp %96 : vector<16x16xf32>
    %cst_31 = arith.constant dense<0.000000e+00> : vector<16xf32>
    %98 = vector.multi_reduction <add>, %97, %cst_31 [1] : vector<16x16xf32> to vector<16xf32>
    %99 = vector.shape_cast %98 : vector<16xf32> to vector<16x1xf32>
    %100 = tpu.reciprocal %99 {approx = true} : vector<16x1xf32> -> vector<16x1xf32>
    %101 = vector.broadcast %100 : vector<16x1xf32> to vector<16x16xf32>
    %102 = arith.mulf %97, %101 : vector<16x16xf32>
    %103 = arith.truncf %102 : vector<16x16xf32> to vector<16x16xbf16>
    %cst_32 = arith.constant dense<0.000000e+00> : vector<16x16xf32>
    %104 = tpu.matmul %103, %90, %cst_32 {dimension_numbers = #tpu.dot_dimension_numbers<[1], [0], [0], [1], [0, 0, 1, 1], [], []>} : vector<16x16xbf16>, vector<16x16xbf16>, vector<16x16xf32> -> vector<16x16xf32>
    %105 = vector.extract_strided_slice %34 {offsets = [0, 64], sizes = [16, 16], strides = [1, 1]} : vector<16x128xbf16> to vector<16x16xbf16>
    %106 = vector.extract_strided_slice %35 {offsets = [0, 64], sizes = [16, 16], strides = [1, 1]} : vector<16x128xbf16> to vector<16x16xbf16>
    %107 = vector.extract_strided_slice %36 {offsets = [0, 64], sizes = [16, 16], strides = [1, 1]} : vector<16x128xbf16> to vector<16x16xbf16>
    %cst_33 = arith.constant dense<0.000000e+00> : vector<16x16xf32>
    %108 = tpu.matmul %105, %106, %cst_33 {dimension_numbers = #tpu.dot_dimension_numbers<[1], [1], [0], [0], [0, 0, 1, 0], [], []>} : vector<16x16xbf16>, vector<16x16xbf16>, vector<16x16xf32> -> vector<16x16xf32>
    %109 = arith.addf %108, %2 : vector<16x16xf32>
    %cst_34 = arith.constant dense<0xFF800000> : vector<16xf32>
    %110 = vector.multi_reduction <maximumf>, %109, %cst_34 [1] : vector<16x16xf32> to vector<16xf32>
    %111 = vector.shape_cast %110 : vector<16xf32> to vector<16x1xf32>
    %112 = vector.broadcast %111 : vector<16x1xf32> to vector<16x16xf32>
    %113 = arith.subf %109, %112 : vector<16x16xf32>
    %114 = math.exp %113 : vector<16x16xf32>
    %cst_35 = arith.constant dense<0.000000e+00> : vector<16xf32>
    %115 = vector.multi_reduction <add>, %114, %cst_35 [1] : vector<16x16xf32> to vector<16xf32>
    %116 = vector.shape_cast %115 : vector<16xf32> to vector<16x1xf32>
    %117 = tpu.reciprocal %116 {approx = true} : vector<16x1xf32> -> vector<16x1xf32>
    %118 = vector.broadcast %117 : vector<16x1xf32> to vector<16x16xf32>
    %119 = arith.mulf %114, %118 : vector<16x16xf32>
    %120 = arith.truncf %119 : vector<16x16xf32> to vector<16x16xbf16>
    %cst_36 = arith.constant dense<0.000000e+00> : vector<16x16xf32>
    %121 = tpu.matmul %120, %107, %cst_36 {dimension_numbers = #tpu.dot_dimension_numbers<[1], [0], [0], [1], [0, 0, 1, 1], [], []>} : vector<16x16xbf16>, vector<16x16xbf16>, vector<16x16xf32> -> vector<16x16xf32>
    %122 = vector.extract_strided_slice %34 {offsets = [0, 80], sizes = [16, 16], strides = [1, 1]} : vector<16x128xbf16> to vector<16x16xbf16>
    %123 = vector.extract_strided_slice %35 {offsets = [0, 80], sizes = [16, 16], strides = [1, 1]} : vector<16x128xbf16> to vector<16x16xbf16>
    %124 = vector.extract_strided_slice %36 {offsets = [0, 80], sizes = [16, 16], strides = [1, 1]} : vector<16x128xbf16> to vector<16x16xbf16>
    %cst_37 = arith.constant dense<0.000000e+00> : vector<16x16xf32>
    %125 = tpu.matmul %122, %123, %cst_37 {dimension_numbers = #tpu.dot_dimension_numbers<[1], [1], [0], [0], [0, 0, 1, 0], [], []>} : vector<16x16xbf16>, vector<16x16xbf16>, vector<16x16xf32> -> vector<16x16xf32>
    %126 = arith.addf %125, %2 : vector<16x16xf32>
    %cst_38 = arith.constant dense<0xFF800000> : vector<16xf32>
    %127 = vector.multi_reduction <maximumf>, %126, %cst_38 [1] : vector<16x16xf32> to vector<16xf32>
    %128 = vector.shape_cast %127 : vector<16xf32> to vector<16x1xf32>
    %129 = vector.broadcast %128 : vector<16x1xf32> to vector<16x16xf32>
    %130 = arith.subf %126, %129 : vector<16x16xf32>
    %131 = math.exp %130 : vector<16x16xf32>
    %cst_39 = arith.constant dense<0.000000e+00> : vector<16xf32>
    %132 = vector.multi_reduction <add>, %131, %cst_39 [1] : vector<16x16xf32> to vector<16xf32>
    %133 = vector.shape_cast %132 : vector<16xf32> to vector<16x1xf32>
    %134 = tpu.reciprocal %133 {approx = true} : vector<16x1xf32> -> vector<16x1xf32>
    %135 = vector.broadcast %134 : vector<16x1xf32> to vector<16x16xf32>
    %136 = arith.mulf %131, %135 : vector<16x16xf32>
    %137 = arith.truncf %136 : vector<16x16xf32> to vector<16x16xbf16>
    %cst_40 = arith.constant dense<0.000000e+00> : vector<16x16xf32>
    %138 = tpu.matmul %137, %124, %cst_40 {dimension_numbers = #tpu.dot_dimension_numbers<[1], [0], [0], [1], [0, 0, 1, 1], [], []>} : vector<16x16xbf16>, vector<16x16xbf16>, vector<16x16xf32> -> vector<16x16xf32>
    %cst_41 = arith.constant 0.000000e+00 : f32
    %139 = vector.broadcast %cst_41 : f32 to vector<16x32xf32>
    %140 = tpu.concatenate %53, %70, %87, %104, %121, %138, %139 in 1 : vector<16x16xf32>, vector<16x16xf32>, vector<16x16xf32>, vector<16x16xf32>, vector<16x16xf32>, vector<16x16xf32>, vector<16x32xf32> -> vector<16x128xf32>
    %141 = arith.truncf %140 : vector<16x128xf32> to vector<16x128xbf16>
    %c0_42 = arith.constant 0 : index
    %c0_43 = arith.constant 0 : index
    %142 = vector.load %arg7[%c0_42, %c0_43] : memref<128x128xbf16, #tpu.memory_space<vmem>>, vector<128x128xbf16>
    %cst_44 = arith.constant dense<0.000000e+00> : vector<16x128xf32>
    %143 = tpu.matmul %141, %142, %cst_44 {dimension_numbers = #tpu.dot_dimension_numbers<[1], [0], [0], [1], [0, 0, 1, 1], [], []>} : vector<16x128xbf16>, vector<128x128xbf16>, vector<16x128xf32> -> vector<16x128xf32>
    %c0_45 = arith.constant 0 : index
    %c0_46 = arith.constant 0 : index
    %144 = vector.load %arg8[%c0_45, %c0_46] : memref<1x128xf32, #tpu.memory_space<vmem>>, vector<1x128xf32>
    %145 = vector.broadcast %144 : vector<1x128xf32> to vector<16x128xf32>
    %146 = arith.addf %143, %145 : vector<16x128xf32>
    %147 = arith.addf %1, %146 : vector<16x128xf32>
    %c0_47 = arith.constant 0 : index
    %c0_48 = arith.constant 0 : index
    %148 = vector.load %arg9[%c0_47, %c0_48] : memref<1x128xf32, #tpu.memory_space<vmem>>, vector<1x128xf32>
    %c0_49 = arith.constant 0 : index
    %c0_50 = arith.constant 0 : index
    %149 = vector.load %arg10[%c0_49, %c0_50] : memref<1x128xf32, #tpu.memory_space<vmem>>, vector<1x128xf32>
    %cst_51 = arith.constant dense<0.000000e+00> : vector<16xf32>
    %150 = vector.multi_reduction <add>, %147, %cst_51 [1] : vector<16x128xf32> to vector<16xf32>
    %151 = vector.shape_cast %150 : vector<16xf32> to vector<16x1xf32>
    %cst_52 = arith.constant 0.010416667 : f32
    %152 = vector.broadcast %cst_52 : f32 to vector<16x1xf32>
    %153 = arith.mulf %151, %152 : vector<16x1xf32>
    %154 = arith.mulf %147, %147 : vector<16x128xf32>
    %cst_53 = arith.constant dense<0.000000e+00> : vector<16xf32>
    %155 = vector.multi_reduction <add>, %154, %cst_53 [1] : vector<16x128xf32> to vector<16xf32>
    %156 = vector.shape_cast %155 : vector<16xf32> to vector<16x1xf32>
    %cst_54 = arith.constant 0.010416667 : f32
    %157 = vector.broadcast %cst_54 : f32 to vector<16x1xf32>
    %158 = arith.mulf %156, %157 : vector<16x1xf32>
    %159 = arith.mulf %153, %153 : vector<16x1xf32>
    %160 = arith.subf %158, %159 : vector<16x1xf32>
    %161 = vector.broadcast %153 : vector<16x1xf32> to vector<16x128xf32>
    %162 = arith.subf %147, %161 : vector<16x128xf32>
    %cst_55 = arith.constant 9.99999974E-6 : f32
    %163 = vector.broadcast %cst_55 : f32 to vector<16x1xf32>
    %164 = arith.addf %160, %163 : vector<16x1xf32>
    %165 = math.rsqrt %164 : vector<16x1xf32>
    %166 = vector.broadcast %165 : vector<16x1xf32> to vector<16x128xf32>
    %167 = arith.mulf %162, %166 : vector<16x128xf32>
    %168 = vector.broadcast %148 : vector<1x128xf32> to vector<16x128xf32>
    %169 = arith.mulf %167, %168 : vector<16x128xf32>
    %170 = vector.broadcast %149 : vector<1x128xf32> to vector<16x128xf32>
    %171 = arith.addf %169, %170 : vector<16x128xf32>
    %172 = arith.truncf %171 : vector<16x128xf32> to vector<16x128xbf16>
    %c0_56 = arith.constant 0 : index
    %c0_57 = arith.constant 0 : index
    %173 = vector.load %arg11[%c0_56, %c0_57] : memref<128x384xbf16, #tpu.memory_space<vmem>>, vector<128x384xbf16>
    %cst_58 = arith.constant dense<0.000000e+00> : vector<16x384xf32>
    %174 = tpu.matmul %172, %173, %cst_58 {dimension_numbers = #tpu.dot_dimension_numbers<[1], [0], [0], [1], [0, 0, 1, 1], [], []>} : vector<16x128xbf16>, vector<128x384xbf16>, vector<16x384xf32> -> vector<16x384xf32>
    %c0_59 = arith.constant 0 : index
    %c0_60 = arith.constant 0 : index
    %175 = vector.load %arg12[%c0_59, %c0_60] : memref<1x384xf32, #tpu.memory_space<vmem>>, vector<1x384xf32>
    %176 = vector.broadcast %175 : vector<1x384xf32> to vector<16x384xf32>
    %177 = arith.addf %174, %176 : vector<16x384xf32>
    %cst_61 = arith.constant 0.000000e+00 : f32
    %178 = vector.broadcast %cst_61 : f32 to vector<16x384xf32>
    %179 = arith.maximumf %177, %178 : vector<16x384xf32>
    %180 = arith.truncf %179 : vector<16x384xf32> to vector<16x384xbf16>
    %c0_62 = arith.constant 0 : index
    %c0_63 = arith.constant 0 : index
    %181 = vector.load %arg13[%c0_62, %c0_63] : memref<384x128xbf16, #tpu.memory_space<vmem>>, vector<384x128xbf16>
    %cst_64 = arith.constant dense<0.000000e+00> : vector<16x128xf32>
    %182 = tpu.matmul %180, %181, %cst_64 {dimension_numbers = #tpu.dot_dimension_numbers<[1], [0], [0], [1], [0, 0, 1, 1], [], []>} : vector<16x384xbf16>, vector<384x128xbf16>, vector<16x128xf32> -> vector<16x128xf32>
    %c0_65 = arith.constant 0 : index
    %c0_66 = arith.constant 0 : index
    %183 = vector.load %arg14[%c0_65, %c0_66] : memref<1x128xf32, #tpu.memory_space<vmem>>, vector<1x128xf32>
    %184 = vector.broadcast %183 : vector<1x128xf32> to vector<16x128xf32>
    %185 = arith.addf %182, %184 : vector<16x128xf32>
    %186 = arith.addf %147, %185 : vector<16x128xf32>
    %187 = vector.shape_cast %186 : vector<16x128xf32> to vector<1x16x128xf32>
    %c0_67 = arith.constant 0 : index
    %c0_68 = arith.constant 0 : index
    %c0_69 = arith.constant 0 : index
    %188 = vector.load %arg15[%c0_67, %c0_68, %c0_69] : memref<1x16x128xf32, #tpu.memory_space<vmem>>, vector<1x16x128xf32>
    tpu.vector_store %arg15[%c0_67, %c0_68, %c0_69], %187 {strides = array<i32>} : memref<1x16x128xf32, #tpu.memory_space<vmem>>, vector<1x16x128xf32>,
    return
  }
  func.func @transform_0(%arg0: i32) -> (i32, i32, i32) {
    %c0_i32 = arith.constant 0 : i32
    %c0_i32_0 = arith.constant 0 : i32
    %c0_i32_1 = arith.constant 0 : i32
    return %arg0, %c0_i32, %c0_i32_0 : i32, i32, i32
  }
  func.func @transform_1(%arg0: i32) -> (i32, i32) {
    %c0_i32 = arith.constant 0 : i32
    %c0_i32_0 = arith.constant 0 : i32
    %c0_i32_1 = arith.constant 0 : i32
    return %c0_i32, %c0_i32_0 : i32, i32
  }
  func.func @transform_2(%arg0: i32) -> (i32, i32) {
    %c0_i32 = arith.constant 0 : i32
    %c0_i32_0 = arith.constant 0 : i32
    %c0_i32_1 = arith.constant 0 : i32
    return %c0_i32, %c0_i32_0 : i32, i32
  }
  func.func @transform_3(%arg0: i32) -> (i32, i32) {
    %c0_i32 = arith.constant 0 : i32
    %c0_i32_0 = arith.constant 0 : i32
    %c0_i32_1 = arith.constant 0 : i32
    return %c0_i32, %c0_i32_0 : i32, i32
  }
  func.func @transform_4(%arg0: i32) -> (i32, i32) {
    %c0_i32 = arith.constant 0 : i32
    %c0_i32_0 = arith.constant 0 : i32
    %c0_i32_1 = arith.constant 0 : i32
    return %c0_i32, %c0_i32_0 : i32, i32
  }
  func.func @transform_5(%arg0: i32) -> (i32, i32) {
    %c0_i32 = arith.constant 0 : i32
    %c0_i32_0 = arith.constant 0 : i32
    %c0_i32_1 = arith.constant 0 : i32
    return %c0_i32, %c0_i32_0 : i32, i32
  }
  func.func @transform_6(%arg0: i32) -> (i32, i32) {
    %c0_i32 = arith.constant 0 : i32
    %c0_i32_0 = arith.constant 0 : i32
    %c0_i32_1 = arith.constant 0 : i32
    return %c0_i32, %c0_i32_0 : i32, i32
  }
  func.func @transform_7(%arg0: i32) -> (i32, i32) {
    %c0_i32 = arith.constant 0 : i32
    %c0_i32_0 = arith.constant 0 : i32
    %c0_i32_1 = arith.constant 0 : i32
    return %c0_i32, %c0_i32_0 : i32, i32
  }
  func.func @transform_8(%arg0: i32) -> (i32, i32) {
    %c0_i32 = arith.constant 0 : i32
    %c0_i32_0 = arith.constant 0 : i32
    %c0_i32_1 = arith.constant 0 : i32
    return %c0_i32, %c0_i32_0 : i32, i32
  }
  func.func @transform_9(%arg0: i32) -> (i32, i32) {
    %c0_i32 = arith.constant 0 : i32
    %c0_i32_0 = arith.constant 0 : i32
    %c0_i32_1 = arith.constant 0 : i32
    return %c0_i32, %c0_i32_0 : i32, i32
  }
  func.func @transform_10(%arg0: i32) -> (i32, i32) {
    %c0_i32 = arith.constant 0 : i32
    %c0_i32_0 = arith.constant 0 : i32
    %c0_i32_1 = arith.constant 0 : i32
    return %c0_i32, %c0_i32_0 : i32, i32
  }
  func.func @transform_11(%arg0: i32) -> (i32, i32) {
    %c0_i32 = arith.constant 0 : i32
    %c0_i32_0 = arith.constant 0 : i32
    %c0_i32_1 = arith.constant 0 : i32
    return %c0_i32, %c0_i32_0 : i32, i32
  }
  func.func @transform_12(%arg0: i32) -> (i32, i32) {
    %c0_i32 = arith.constant 0 : i32
    %c0_i32_0 = arith.constant 0 : i32
    %c0_i32_1 = arith.constant 0 : i32
    return %c0_i32, %c0_i32_0 : i32, i32
  }
  func.func @transform_13(%arg0: i32) -> (i32, i32) {
    %c0_i32 = arith.constant 0 : i32
    %c0_i32_0 = arith.constant 0 : i32
    %c0_i32_1 = arith.constant 0 : i32
    return %c0_i32, %c0_i32_0 : i32, i32
  }
  func.func @transform_14(%arg0: i32) -> (i32, i32, i32) {
    %c0_i32 = arith.constant 0 : i32
    %c0_i32_0 = arith.constant 0 : i32
    %c0_i32_1 = arith.constant 0 : i32
    return %arg0, %c0_i32, %c0_i32_0 : i32, i32, i32
  }
}

</mosaic_0001>

<bundles_post_ra>
// kernel: tpu_custom_call.1
= control target key start
LH: loop header
LB: loop body
LE: loop exit
PB: predicated region body
PF: predicated region fallthrough
CT: control target
= control target key end

     0   :  { %s4104_s0 = inlined_call_operand.hbm [shape: f32[2,16,128], index: 0, kind: input, shape index: {}]   ;;  %s4105_s1 = inlined_call_operand.hbm [shape: f32[16,16], index: 1, kind: input, shape index: {}]   ;;  %s4106_s2 = inlined_call_operand.vmem [shape: f32[1,128], index: 2, kind: input, shape index: {}]   ;;  %s4107_s3 = inlined_call_operand.vmem [shape: f32[1,128], index: 3, kind: input, shape index: {}]   ;;  %s4108_s4 = inlined_call_operand.hbm [shape: bf16[128,384], index: 4, kind: input, shape index: {}]   ;;  %s4109_s5 = inlined_call_operand.vmem [shape: f32[1,384], index: 5, kind: input, shape index: {}]   ;;  %s4110_s6 = inlined_call_operand.hbm [shape: bf16[128,128], index: 6, kind: input, shape index: {}]   ;;  %s4111_s7 = inlined_call_operand.vmem [shape: f32[1,128], index: 7, kind: input, shape index: {}]   ;;  %s4112_s8 = inlined_call_operand.vmem [shape: f32[1,128], index: 8, kind: input, shape index: {}]   ;;  %s4113_s9 = inlined_call_operand.vmem [shape: f32[1,128], index: 9, kind: input, shape index: {}]   ;;  %s4114_s10 = inlined_call_operand.hbm [shape: bf16[128,384], index: 10, kind: input, shape index: {}]   ;;  %s4115_s11 = inlined_call_operand.vmem [shape: f32[1,384], index: 11, kind: input, shape index: {}]   ;;  %s4116_s12 = inlined_call_operand.hbm [shape: bf16[384,128], index: 12, kind: input, shape index: {}]   ;;  %s4117_s13 = inlined_call_operand.vmem [shape: f32[1,128], index: 13, kind: input, shape index: {}]   ;;  %s4118_s14 = inlined_call_operand.hbm [shape: f32[2,16,128], index: 14, kind: output, shape index: {}]  }
   0x1   :  { %4127 = sst [smem:[#allocation19_spill]] %s4105_s1 }
   0x2   :  { %4128 = sst [smem:[#allocation20_spill]] %s4110_s6 }
   0x3   :  { %4129 = sst [smem:[#allocation21_spill]] %s4111_s7 }
   0x4   :  { %4130 = sst [smem:[#allocation22_spill]] %s4112_s8 }
   0x5   :  { %4131 = sst [smem:[#allocation23_spill]] %s4113_s9 }
   0x6   :  { %4132 = sst [smem:[#allocation24_spill]] %s4115_s11 }
   0x7   :  { %4133 = sst [smem:[#allocation25_spill]] %s4117_s13 }
   0x8   :  { %4134 = sst [smem:[#allocation26_spill]] %s4118_s14 }
   0x9   :  { %19 = vsyncpa [#allocation3], 0 }
   0xa   :  { %21 = vsyncpa [#allocation3 + $0x1], 0 }
   0xb   :  { %22 = vsyncpa [#allocation6], 0 }
   0xc   :  { %23 = vsyncpa [#allocation9], 0 }
   0xd   :  { %24 = vsyncpa [#allocation12], 0 }
   0xe   :  { %25 = vsyncpa [#allocation4], 0 }
   0xf   :  { %27 = vsyncpa [#allocation4 + $0x1], 0  ;;  %s3508_s29 = smov 0   ;;  %s3510_s30 = smov 0  }
  0x10   :  { %s3512_s15 = smov 0   ;;  %s3514_s16 = smov 0  }
  0x11 LB: > { %s3408_s17 = smov [#allocation5]   ;;  %s3529_s19 = sadd.s32 4294967295, %s3406_s16   ;;  %s3406_s16 = sphi %s3514_s16, %s4168_s16   ;;  %s3402_s15 = sphi %s3512_s15, %s4167_s15   ;;  %s3398_s30 = sphi %s3510_s30, %s4166_s30   ;;  %s3394_s29 = sphi %s3508_s29, %s4165_s29  }
  0x12   : > { %s375_s18 = sshll.u32 %s3408_s17, 4  ;;  %p2504_p0 = scmp.ge.s32.totalorder %s3406_s16, 1  ;;  %s3534_s18 = int_to_ptr.vmem [resolvable:$true] %s375_s18 }
  0x13   : > { %p4121_p1 = scmp.eq.s32.totalorder %s3529_s19, 0  ;;  %p363_p2 = scmp.lt.s32.totalorder %s3406_s16, 3 }
  0x14   : > { %s3409_s21 = smov [#allocation8]   ;;  %s3410_s24 = smov [#allocation7]  }
  0x15   : > { %p3536_p3 = pnand %p2504_p0, %p363_p2  ;;  %s410_s22 = sshll.u32 %s3409_s21, 4  ;;  %s3549_s22 = int_to_ptr.vmem [resolvable:$true] %s410_s22 }
  0x16   : > { %s3551_s25 = sshll.u32 %s3410_s24, 4  ;;  %s4137_s1 = sld [smem:[#allocation19_spill]]  ;;  %s395_s25 = int_to_ptr.vmem [resolvable:$true] %s3551_s25 }
  0x17   : > { %s4135_s20 = scalar_select %p3536_p3, 1, 0 }
  0x18   : > { %p2888_p5 = pneg %p3536_p3 }
  0x1a   : > { %p3545_p6 = pnand %p2888_p5, %p4121_p1 }
  0x1c   : > { %s3158_s28 = scalar_lea.hbm %s4137_s1, 256  ;;  %p3561_p8 = pneg %p3545_p6 }
  0x1d   : > { %p3159_p7 = scmp.ne.s32.totalorder %s4137_s1, %s3158_s28  ;;  %p3165_p11 = scmp.lt.u32.totalorder %s3158_s28, %s4137_s1 }
  0x1f   : > { %p3161_p9 = pnand %p3561_p8, %p3159_p7 }
  0x21   : > { %p3162_p10 = pneg %p3161_p9 }
  0x23   : > { %p3167_p12 = pnand %p3165_p11, %p3162_p10 }
  0x25   : > { %3170 = shalt.err (!%p3167_p12)
}
  0x26   : > { %s3171_s14 = scalar_lea.vmem %s3534_s18, 256  ;;  %p3179_p5 = scmp.lt.s32.totalorder %s3534_s18, %s3534_s18 }
  0x27   : > { %p3172_p13 = scmp.ne.s32.totalorder %s3534_s18, %s3171_s14  ;;  %p3180_p4 = scmp.lt.s32.totalorder %s3171_s14, %s3171_s14 }
  0x29   : > { %p3174_p0 = pnand %p3172_p13, %p3561_p8  ;;  %p3181_p7 = por %p3180_p4, %p3179_p5 }
  0x2b   : > { %p3175_p2 = pneg %p3174_p0 }
  0x2d   : > { %p3182_p9 = pnand %p3181_p7, %p3175_p2 }
  0x2f   : > { %3185 = shalt.err (!%p3182_p9)
}
  0x30   : > { %s4120_s26 = smov 128   ;;  %s4123_s13 = smov 8  }
  0x31   : > { %2891 = dma.hbm_to_vmem [thread:$0]  (!%p3545_p6), %s4137_s1, 256, %s3534_s18, [#allocation6], %s4120_s26, %s4120_s26, %s4123_s13  }
  0x32   : > { %s4139_s6 = sld [smem:[#allocation20_spill]] }
  0x38   : > { %s3186_s14 = scalar_lea.hbm %s4139_s6, 1024 }
  0x39   : > { %p3187_p4 = scmp.ne.s32.totalorder %s4139_s6, %s3186_s14  ;;  %p3193_p12 = scmp.lt.u32.totalorder %s3186_s14, %s4139_s6 }
  0x3b   : > { %p3189_p10 = pnand %p3187_p4, %p3561_p8 }
  0x3d   : > { %p3190_p11 = pneg %p3189_p10 }
  0x3f   : > { %p3195_p13 = pnand %p3193_p12, %p3190_p11 }
  0x41   : > { %3198 = shalt.err (!%p3195_p13)
}
  0x42   : > { %s3199_s18 = scalar_lea.vmem %s3549_s22, 1024  ;;  %p3207_p7 = scmp.lt.s32.totalorder %s3549_s22, %s3549_s22 }
  0x43   : > { %p3200_p0 = scmp.ne.s32.totalorder %s3549_s22, %s3199_s18  ;;  %p3208_p9 = scmp.lt.s32.totalorder %s3199_s18, %s3199_s18 }
  0x45   : > { %p3202_p2 = pnand %p3200_p0, %p3561_p8  ;;  %p3209_p4 = por %p3208_p9, %p3207_p7 }
  0x47   : > { %p3203_p5 = pneg %p3202_p2 }
  0x49   : > { %p3210_p10 = pnand %p3209_p4, %p3203_p5 }
  0x4b   : > { %3213 = shalt.err (!%p3210_p10)
}
  0x4c   : > { %s4124_s9 = smov 64   ;;  %s4125_s7 = smov 4  }
  0x4d   : > { %2897 = dma.hbm_to_vmem [thread:$0]  (!%p3545_p6), %s4139_s6, 1024, %s3549_s22, [#allocation9], %s4124_s9, %s4124_s9, %s4125_s7  }
  0x4e   : > { %s3214_s17 = scalar_lea.hbm %s4108_s4, 3072 }
  0x4f   : > { %p3215_p11 = scmp.ne.s32.totalorder %s4108_s4, %s3214_s17  ;;  %p3221_p0 = scmp.lt.u32.totalorder %s3214_s17, %s4108_s4 }
  0x51   : > { %p3217_p12 = pnand %p3215_p11, %p3561_p8 }
  0x53   : > { %p3218_p13 = pneg %p3217_p12 }
  0x55   : > { %p3223_p2 = pnand %p3221_p0, %p3218_p13 }
  0x57   : > { %3226 = shalt.err (!%p3223_p2)
}
  0x58   : > { %s3227_s8 = scalar_lea.vmem %s395_s25, 3072  ;;  %p3235_p4 = scmp.lt.s32.totalorder %s395_s25, %s395_s25 }
  0x59   : > { %p3228_p5 = scmp.ne.s32.totalorder %s395_s25, %s3227_s8  ;;  %p3236_p10 = scmp.lt.s32.totalorder %s3227_s8, %s3227_s8 }
  0x5b   : > { %p3230_p7 = pnand %p3228_p5, %p3561_p8  ;;  %p3237_p1 = por %p3236_p10, %p3235_p4 }
  0x5d   : > { %p3231_p9 = pneg %p3230_p7 }
  0x5f   : > { %p3238_p3 = pnand %p3237_p1, %p3231_p9 }
  0x61   : > { %3241 = shalt.err (!%p3238_p3)
}
  0x62   : > { %s3415_s22 = smov 192   ;;  %s3416_s11 = smov 12  }
  0x63   : > { %2894 = dma.hbm_to_vmem [thread:$0]  (!%p3545_p6), %s4108_s4, 3072, %s395_s25, [#allocation6], %s3415_s22, %s3415_s22, %s3416_s11  }
  0x64   : > { %s3417_s28 = smov [#allocation10]   ;;  %s3418_s24 = smov [#allocation11]  }
  0x65   : > { %s432_s17 = sshll.u32 %s3417_s28, 4  ;;  %s448_s14 = sshll.u32 %s3418_s24, 4  ;;  %s433_s17 = int_to_ptr.vmem [resolvable:$true] %s432_s17  ;;  %s449_s14 = int_to_ptr.vmem [resolvable:$true] %s448_s14 }
  0x66   : > { %s3242_s8 = scalar_lea.hbm %s4114_s10, 3072 }
  0x67   : > { %p3243_p1 = scmp.ne.s32.totalorder %s4114_s10, %s3242_s8  ;;  %p3249_p12 = scmp.lt.u32.totalorder %s3242_s8, %s4114_s10 }
  0x69   : > { %p3245_p3 = pnand %p3243_p1, %p3561_p8 }
  0x6b   : > { %p3246_p11 = pneg %p3245_p3 }
  0x6d   : > { %p3251_p13 = pnand %p3249_p12, %p3246_p11 }
  0x6f   : > { %3254 = shalt.err (!%p3251_p13)
}
  0x70   : > { %s3255_s25 = scalar_lea.vmem %s433_s17, 3072  ;;  %p3263_p7 = scmp.lt.s32.totalorder %s433_s17, %s433_s17 }
  0x71   : > { %p3256_p0 = scmp.ne.s32.totalorder %s433_s17, %s3255_s25  ;;  %p3264_p9 = scmp.lt.s32.totalorder %s3255_s25, %s3255_s25 }
  0x73   : > { %p3258_p2 = pnand %p3256_p0, %p3561_p8  ;;  %p3265_p4 = por %p3264_p9, %p3263_p7 }
  0x75   : > { %p3259_p5 = pneg %p3258_p2 }
  0x77   : > { %p3266_p10 = pnand %p3265_p4, %p3259_p5 }
  0x79   : > { %3269 = shalt.err (!%p3266_p10)
}
  0x7a   : > { %2900 = dma.hbm_to_vmem [thread:$0]  (!%p3545_p6), %s4114_s10, 3072, %s433_s17, [#allocation9], %s3415_s22, %s3415_s22, %s3416_s11  }
  0x7b   : > { %s3270_s7 = scalar_lea.hbm %s4116_s12, 3072 }
  0x7c   : > { %p3271_p1 = scmp.ne.s32.totalorder %s4116_s12, %s3270_s7  ;;  %p3277_p12 = scmp.lt.u32.totalorder %s3270_s7, %s4116_s12 }
  0x7e   : > { %p3273_p3 = pnand %p3271_p1, %p3561_p8 }
  0x80   : > { %p3274_p11 = pneg %p3273_p3 }
  0x82   : > { %p3279_p13 = pnand %p3277_p12, %p3274_p11 }
  0x84   : > { %3282 = shalt.err (!%p3279_p13)
}
  0x85   : > { %s3283_s18 = scalar_lea.vmem %s449_s14, 3072  ;;  %p3291_p7 = scmp.lt.s32.totalorder %s449_s14, %s449_s14 }
  0x86   : > { %p3284_p0 = scmp.ne.s32.totalorder %s449_s14, %s3283_s18  ;;  %p3292_p9 = scmp.lt.s32.totalorder %s3283_s18, %s3283_s18 }
  0x88   : > { %p3286_p2 = pnand %p3284_p0, %p3561_p8  ;;  %p3293_p4 = por %p3292_p9, %p3291_p7 }
  0x8a   : > { %p3287_p5 = pneg %p3286_p2 }
  0x8c   : > { %p3294_p10 = pnand %p3293_p4, %p3287_p5 }
  0x8e   : > { %3297 = shalt.err (!%p3294_p10)
}
  0x8f   : > { %s4140_s22 = smov 4   ;;  %s4141_s11 = smov 64  }
  0x90   : > { %2903 = dma.hbm_to_vmem [thread:$0]  (!%p3545_p6), %s4116_s12, 3072, %s449_s14, [#allocation12], %s4141_s11, %s4141_s11, %s4140_s22  }
  0x91   : > { %s2503_s23 = sadd.s32 4294967294, %s3406_s16   ;;  %s3671_s21 = sadd.s32 1, %s3406_s16  }
  0x92   : > { %s40_s25 = sadd.s32 1, %s3402_s15  ;;  %s37_s13 = ssub.s32 %s3406_s16, %s3671_s21 }
  0x93   : > { %p47_p8 = scmp.ne.s32.totalorder %s3402_s15, %s3398_s30  ;;  %p38_p1 = scmp.eq.s32.totalorder %s37_s13, 0 }
  0x94   : > { %p48_p3 = scmp.eq.s32.totalorder %s3406_s16, 0  ;;  %p53_p11 = scmp.ne.s32.totalorder %s3398_s30, %s3394_s29 }
  0x95   : > { %p350_p12 = scmp.eq.s32.totalorder %s3529_s19, 1  ;;  %p4142_p0 = scmp.eq.s32.totalorder %s3529_s19, 0 }
  0x96   : > { %s3683_s9 = scalar_select %p38_p1, %s3402_s15, %s40_s25  }
  0x97   : > { %p49_p13 = por %p48_p3, %p47_p8  ;;  %p3687_p2 = por %p4142_p0, %p53_p11 }
  0x98   : > { %p3691_p6 = por %p350_p12, %p47_p8  ;;  %p356_p5 = scmp.eq.s32.totalorder %s2503_s23, 1 }
  0x99   : > { %p2917_p7 = scmp.lt.s32.totalorder %s3406_s16, 2  ;;  %s465_s6 = sand.u32 1, %s3402_s15  }
  0x9a   : > { %s4144_s14 = scalar_select %p3691_p6, 1, 0 }
  0x9b   : > { %p3697_p9 = por %p356_p5, %p53_p11  ;;  %s2511_s26 = sshll.u32 %s465_s6, 4 }
  0x9c   : > { %s2628_s27 = sshll.u32 %s3406_s16, 8  ;;  %s469_s22 = scalar_lea.vmem [#allocation2], %s2511_s26 }
  0x9d   : > { %s4145_s7 = scalar_select %p3697_p9, 1, 0 }
  0x9e   : > { %s3705_s18 = scalar_lea.hbm %s4104_s0, %s2628_s27  ;;  %s476_s11 = sshll.u32 %s469_s22, 4  ;;  %s3711_s11 = int_to_ptr.vmem [resolvable:$true] %s476_s11 }
  0x9f   : > { %p3707_p4 = pnand %p2917_p7, %p49_p13  ;;  %s3713_s8 = scalar_lea.sflag [#allocation3], %s465_s6 }
  0xa0   : > { %s3298_s23 = scalar_lea.hbm %s3705_s18, 256  ;;  %s3303_s26 = scalar_lea.hbm %s4104_s0, 512 }
  0xa1   : > { %p3299_p10 = scmp.ne.s32.totalorder %s3705_s18, %s3298_s23  ;;  %p3300_p8 = pneg %p3707_p4 }
  0xa2   : > { %p3304_p11 = scmp.lt.u32.totalorder %s3705_s18, %s4104_s0  ;;  %p3305_p12 = scmp.lt.u32.totalorder %s3303_s26, %s3298_s23 }
  0xa3   : > { %p3301_p1 = pnand %p3300_p8, %p3299_p10  ;;  %p3307_p0 = scmp.lt.u32.totalorder %s3298_s23, %s3705_s18 }
  0xa4   : > { %p3306_p13 = por %p3305_p12, %p3304_p11 }
  0xa5   : > { %p3302_p3 = pneg %p3301_p1 }
  0xa6   : > { %p3308_p5 = por %p3307_p0, %p3306_p13 }
  0xa8   : > { %p3309_p7 = pnand %p3308_p5, %p3302_p3 }
  0xaa   : > { %3312 = shalt.err (!%p3309_p7)
}
  0xab   : > { %s3313_s6 = scalar_lea.vmem %s3711_s11, 256  ;;  %s3419_s24 = smov [#allocation2]  }
  0xac   : > { %p3314_p10 = scmp.ne.s32.totalorder %s3711_s11, %s3313_s6  ;;  %s3318_s22 = sshll.u32 %s3419_s24, 4  ;;  %s3319_s22 = int_to_ptr.vmem [resolvable:$false] %s3318_s22 }
  0xad   : > { %s3320_s25 = scalar_lea.vmem %s3319_s22, 512  ;;  %p3321_p6 = scmp.lt.s32.totalorder %s3711_s11, %s3319_s22 }
  0xae   : > { %p3316_p1 = pnand %p3314_p10, %p3300_p8  ;;  %p3322_p11 = scmp.lt.s32.totalorder %s3320_s25, %s3313_s6 }
  0xb0   : > { %p3317_p9 = pneg %p3316_p1  ;;  %p3323_p12 = por %p3322_p11, %p3321_p6 }
  0xb2   : > { %p3324_p13 = pnand %p3323_p12, %p3317_p9 }
  0xb4   : > { %3327 = shalt.err (!%p3324_p13)
}
  0xb5   : > { %s4147_s23 = smov 8   ;;  %s4148_s13 = smov 128  }
  0xb6   : > { %2907 = dma.hbm_to_vmem [thread:$0]  (!%p3707_p4), %s3705_s18, 256, %s3711_s11, %s3713_s8, %s4148_s13, %s4148_s13, %s4147_s23  }
  0xb7   : > { %p4149_p8 = scmp.ne.s32.totalorder %s4135_s20, 0 }
  0xb8   : > { %s3747_s26 = sand.u32 (!%p4149_p8), 1, %s3398_s30  }
  0xb9   : > { %488 = sbr.rel (%p4149_p8) target bundleno = 2921 (0xb69), region = 76  ;;  %s2515_s27 = sshll.u32 (!%p4149_p8), %s3747_s26, 4 }
  0xba   : > { %s491_s28 = scalar_lea.sflag (!%p4149_p8), [#allocation3], %s3747_s26  ;;  %s3753_s17 = scalar_lea.vmem (!%p4149_p8), [#allocation2], %s2515_s27 }
  0xc0   : > { %3373 = dma.done.wait (%p3687_p2), %s491_s28, 256  }
  0xc1   : > { %3375 = vsyncadd (%p3687_p2), %s491_s28, 4294967040  ;;  %p4150_p6 = scmp.eq.s32.totalorder %s3529_s19, 0 }
  0xc3   : > { %3377 = dma.done.wait (%p4150_p6), [#allocation6], 3328   ;;  %p4151_p9 = pmov %p4150_p6 }
  0xc4   : > { %p4152_p4 = pmov %p4150_p6 }
  0xc5   : > { %3379 = vsyncadd (%p4151_p9), [#allocation6], 4294963968 }
  0xc6   : > { %3381 = dma.done.wait (%p4152_p4), [#allocation9], 4096   ;;  %p4153_p3 = pmov %p4152_p4 }
  0xc8   : > { %3383 = vsyncadd (%p4153_p3), [#allocation9], 4294963200  ;;  %p4154_p0 = pmov %p4153_p3 }
  0xca   : > { %3385 = dma.done.wait (%p4154_p0), [#allocation12], 3072   ;;  %p4155_p5 = pmov %p4154_p0 }
  0xcb   : > { %v3420_v0 = vmov 0.0   ;;  %v3773_v1 = vld [vmem:[%s3753_s17] sm:$0xff]  ;;  %v3776_v2 = vld [vmem:[%s3753_s17 + $0x8] sm:$0xff]  ;;  %v3421_v26 = vmov 0   ;;  %vm3422_vm0 = vmmov 0   ;;  %v643_v57 = vlaneseq  ;;  %s3423_s24 = smov 112  }
  0xcc   : > { %3387 = vsyncadd (%p4155_p5), [#allocation12], 4294964224  ;;  %2712 = vmatprep.subr.bf16.mxu1 %v3420_v0  ;;  %566 = vadd.xlane.f32.xlu0 %v3773_v1  ;;  %v572_v3 = vmul.f32 %v3773_v1, %v3773_v1  ;;  %v3004_v4 = vld [vmem:[#allocation7 + $0x4] ss:$12 sps:$4 sm:$0xff]   ;;  %v573_v5 = vmul.f32 %v3776_v2, %v3776_v2  ;;  %v3006_v6 = vld [vmem:[#allocation7] ss:$12 sps:$4 sm:$0xff]  }
  0xcd   : > { %786 = vmatprep.subr.bf16.mxu0 %v3004_v4  ;;  %v3007_v7 = vld [vmem:[#allocation7 + $0x8] ss:$12 sps:$4 sm:$0xff]   ;;  %v3010_v9 = vld [vmem:[#allocation7 + $0x18] ss:$12 sps:$4 sm:$0xff]   ;;  %v3011_v10 = vld [vmem:[#allocation7 + $0x20] ss:$12 sps:$4 sm:$0xff]   ;;  %818 = vmatprep.mubr.bf16.mxu0 %v3421_v26 }
  0xce   : > { %574 = vadd.xlane.f32.xlu1 %v572_v3  ;;  %787 = vmatpush1.bf16.msra.mxu0 %v3006_v6  ;;  %v3008_v8 = vld [vmem:[#allocation7 + $0x1c] ss:$12 sps:$4 sm:$0xff]   ;;  %v3012_v11 = vld [vmem:[#allocation7 + $0x34] ss:$12 sps:$4 sm:$0xff]   ;;  %v3015_v13 = vld [vmem:[#allocation7 + $0x38] ss:$12 sps:$4 sm:$0xff]  }
  0xcf   : > { %2713 = vmatpush3.bf16.msra.mxu1 %v3007_v7  ;;  %788 = vmatprep.subr.bf16.mxu0 %v3008_v8  ;;  %v3014_v12 = vld [vmem:[#allocation7 + $0x30] ss:$12 sps:$4 sm:$0xff]   ;;  %v3016_v14 = vld [vmem:[#allocation7 + $0x4c] ss:$12 sps:$4 sm:$0xff]   ;;  %v3018_v15 = vld [vmem:[#allocation7 + $0x48] ss:$12 sps:$4 sm:$0xff]  }
  0xd0   : > { %568 = vadd.xlane.f32.xlu0 %v3776_v2  ;;  %2714 = vmatprep.subr.bf16.mxu1 %v3420_v0  ;;  %v3019_v16 = vld [vmem:[#allocation7 + $0x50] ss:$12 sps:$4 sm:$0xff]   ;;  %v3022_v18 = vld [vmem:[#allocation7 + $0x60] ss:$12 sps:$4 sm:$0xff]   ;;  %v3023_v19 = vld [vmem:[#allocation7 + $0x68] ss:$12 sps:$4 sm:$0xff]  }
  0xd1   : > { %v3020_v17 = vld [vmem:[#allocation7 + $0x64] ss:$12 sps:$4 sm:$0xff]   ;;  %v3024_v20 = vld [vmem:[#allocation7 + $0x7c] ss:$12 sps:$4 sm:$0xff]   ;;  %v3027_v22 = vld [vmem:[#allocation7 + $0x80] ss:$12 sps:$4 sm:$0xff]   ;;  %2728 = vmatprep.mubr.msk.bf16.mxu1 %vm3422_vm0, %v3420_v0 }
  0xd2   : > { %576 = vadd.xlane.f32.xlu1 %v573_v5  ;;  %789 = vmatpush1.bf16.msra.mxu0 %v3010_v9  ;;  %v3026_v21 = vld [vmem:[#allocation7 + $0x78] ss:$12 sps:$4 sm:$0xff]   ;;  %v3028_v23 = vld [vmem:[#allocation7 + $0x94] ss:$12 sps:$4 sm:$0xff]   ;;  %v3030_v24 = vld [vmem:[#allocation7 + $0x90] ss:$12 sps:$4 sm:$0xff]  }
  0xd3   : > { %2715 = vmatpush3.bf16.msra.mxu1 %v3011_v10  ;;  %790 = vmatprep.subr.bf16.mxu0 %v3012_v11  ;;  %v3031_v25 = vld [vmem:[#allocation7 + $0x98] ss:$12 sps:$4 sm:$0xff]   ;;  %v3034_v28 = vld [vmem:[#allocation7 + $0xa8] ss:$12 sps:$4 sm:$0xff]   ;;  %v3035_v29 = vld [vmem:[#allocation7 + $0xb0] ss:$12 sps:$4 sm:$0xff]  }
  0xd4   : > { %2716 = vmatprep.subr.bf16.mxu1 %v3420_v0  ;;  %v3032_v27 = vld [vmem:[#allocation7 + $0xac] ss:$12 sps:$4 sm:$0xff]   ;;  %v2522_v47 = vld [vmem:[%s4106_s2] ss:$0 sm:$0xff]  ;;  %v3808_v58 = vshrl.u32 %v643_v57, 7  ;;  %vm873_vm1 = vcmask 130048  }
  0xd5   : > { %v2523_v52 = vld [vmem:[%s4107_s3] ss:$0 sm:$0xff]  ;;  %s3424_s22 = smov 96   ;;  %s3425_s25 = smov 80   ;;  %vm1638_vm2 = vcmask 261120   ;;  %vm1641_vm3 = vcmask 392192  }
  0xd6   : > { %791 = vmatpush1.bf16.msra.mxu0 %v3014_v12  ;;  %v645_v59 = vsub.s32 0, %v3808_v58  ;;  %v653_v60 = vsub.s32 2, %v3808_v58  ;;  %v641_v61 = vld [vmem:[%s4109_s5] sm:$0x7]  ;;  %v649_v62 = vsub.s32 1, %v3808_v58  ;;  %s3426_s23 = smov 64  }
  0xd7   : > { %2717 = vmatpush3.bf16.msra.mxu1 %v3015_v13  ;;  %792 = vmatprep.subr.bf16.mxu0 %v3016_v14  ;;  %s3427_s13 = smov 48   ;;  %s3428_s28 = smov 16   ;;  %vm1644_vm4 = vcmask 523264   ;;  %vm1647_vm5 = vcmask 654336   ;;  %vm1650_vm6 = vcmask 785408  }
  0xd8   : > { %2718 = vmatprep.subr.bf16.mxu1 %v3420_v0  ;;  %v646_v63 = vrot.slane %v641_v61, %v645_v59  ;;  %v650_v4 = vrot.slane %v641_v61, %v649_v62  ;;  %s3429_s20 = smov 32   ;;  %vm2569_vm7 = vmpackc.low %vm1650_vm6, %vm1650_vm6  ;;  %s4156_s11 = sld [smem:[#allocation21_spill]] }
  0xd9   : > { %s4157_s6 = sld [smem:[#allocation22_spill]]  ;;  %s4160_s18 = sld [smem:[#allocation25_spill]] }
  0xda   : > { %793 = vmatpush1.bf16.msra.mxu0 %v3018_v15  ;;  %s2629_s8 = sshll.u32 %s3529_s19, 8  ;;  %p4162_p7 = scmp.ne.s32.totalorder %s4144_s14, 0 }
  0xdb   : > { %2719 = vmatpush3.bf16.msra.mxu1 %v3019_v16  ;;  %794 = vmatprep.subr.bf16.mxu0 %v3020_v17  ;;  %s3430_s19 = smov [#allocation13]  }
  0xdc   : > { %2720 = vmatprep.subr.bf16.mxu1 %v3420_v0 }
  0xde   : > { %795 = vmatpush1.bf16.msra.mxu0 %v3022_v18 }
  0xdf   : > { %2721 = vmatpush3.bf16.msra.mxu1 %v3023_v19  ;;  %796 = vmatprep.subr.bf16.mxu0 %v3024_v20 }
  0xe0   : > { %2722 = vmatprep.subr.bf16.mxu1 %v3420_v0 }
  0xe2   : > { %797 = vmatpush1.bf16.msra.mxu0 %v3026_v21  ;;  %v3831_v21 = vld [vmem:[#allocation5] sm:$0xff] }
  0xe3   : > { %2723 = vmatpush3.bf16.msra.mxu1 %v3027_v22  ;;  %798 = vmatprep.subr.bf16.mxu0 %v3028_v23  ;;  %v3833_v23 = vld [vmem:[#allocation5 + $0x8] sm:$0xff] }
  0xe4   : > { %2724 = vmatprep.subr.bf16.mxu1 %v3420_v0 }
  0xe6   : > { %799 = vmatpush1.bf16.msra.mxu0 %v3030_v24 }
  0xe7   : > { %2725 = vmatpush3.bf16.msra.mxu1 %v3031_v25  ;;  %800 = vmatprep.subr.bf16.mxu0 %v3032_v27 }
  0xe8   : > { %2726 = vmatprep.subr.bf16.mxu1 %v3420_v0 }
  0xea   : > { %801 = vmatpush1.bf16.msra.mxu0 %v3034_v28 }
  0xeb   : > { %2727 = vmatpush3.bf16.msra.mxu1 %v3035_v29  ;;  %2756 = vmatprep.subr.bf16.mxu0 %v3420_v0 }
  0xec   : > { %2732 = vmatprep.subr.bf16.mxu1 %v3420_v0 }
 0x159   : > { %v567_v30 = vpop.xlane.xlu0 %566 }
 0x15a   : > { %v570_v31 = vmul.f32 0.010416667, %v567_v30 }
 0x15b   : > { %v575_v32 = vpop.xlane.xlu1 %574 }
 0x15c   : > { %v580_v33 = vmul.f32 %v570_v31, %v570_v31  ;;  %v578_v34 = vmul.f32 0.010416667, %v575_v32  ;;  %v584_v44 = vsub.f32 %v3773_v1, %v570_v31  ;;  %v654_v1 = vrot.slane %v641_v61, %v653_v60 }
 0x15d   : > { %v569_v35 = vpop.xlane.xlu0 %568 }
 0x15e   : > { %v582_v36 = vsub.f32 %v578_v34, %v580_v33  ;;  %v571_v37 = vmul.f32 0.010416667, %v569_v35 }
 0x15f   : > { %v577_v38 = vpop.xlane.xlu1 %576 }
 0x160   : > { %v586_v39 = vadd.f32 1e-05, %v582_v36  ;;  %v581_v40 = vmul.f32 %v571_v37, %v571_v37  ;;  %v579_v41 = vmul.f32 0.010416667, %v577_v38  ;;  %v585_v48 = vsub.f32 %v3776_v2, %v571_v37 }
 0x162   : > { %3100 = vrsqrt.f32 %v586_v39  ;;  %v583_v42 = vsub.f32 %v579_v41, %v581_v40 }
 0x164   : > { %v587_v43 = vadd.f32 1e-05, %v583_v42 }
 0x166   : > { %3102 = vrsqrt.f32 %v587_v43 }
 0x16c   : > { %v3101_v45 = vpop.eup %3100 }
 0x16d   : > { %v590_v46 = vmul.f32 %v3101_v45, %v584_v44 }
 0x16f   : > { %v598_v51 = vmul.f32 %v2522_v47, %v590_v46 }
 0x170   : > { %v3103_v49 = vpop.eup %3102 }
 0x171   : > { %v591_v50 = vmul.f32 %v3103_v49, %v585_v48  ;;  %v606_v54 = vadd.f32 %v2523_v52, %v598_v51 }
 0x173   : > { %v599_v53 = vmul.f32 %v2522_v47, %v591_v50 }
 0x175   : > { %v607_v55 = vadd.f32 %v2523_v52, %v599_v53 }
 0x177   : > { %v608_v56 = vpack.c.bf16 %v607_v55, %v606_v54 }
 0x179   : > { %819 = vmatmul.mubr.bf16.vlgmr.msra.gmra.mrb[0].mxu0 %v608_v56  ;;  %2729 = vmatmul.mubr.bf16.vlgmr.msra.gmra.mrb[0].mxu1 %v608_v56 }
 0x17a   : > { %2734 = vmatprep.mubr.msk.bf16.mxu1 %vm3422_vm0, %v3420_v0  ;;  %2758 = vmatprep.mubr.msk.bf16.mxu0 %vm3422_vm0, %v3420_v0 }
 0x24c   : > { %v820_v2 = vpop.f32.mrb[0].mxu0  ;;  %v863_v3 = vpop.f32.mrb[0].mxu1 }
 0x24d   : > { %v822_v5 = vpop.f32.mrb[1].mxu0  ;;  %v2730_v6 = vpop.f32.mrb[1].mxu1  ;;  %v821_v9 = vadd.f32 %v820_v2, %v646_v63  ;;  %v864_v10 = vadd.f32 %v863_v3, %v654_v1 }
 0x24e   : > { %v824_v7 = vpop.f32.mrb[2].mxu0  ;;  %v866_v8 = vpop.f32.mrb[2].mxu1  ;;  %v823_v15 = vadd.f32 %v822_v5, %v650_v4 }
 0x24f   : > { %v825_v11 = vadd.f32 %v824_v7, %v646_v63  ;;  %v867_v12 = vadd.f32 %v866_v8, %v654_v1  ;;  %v826_v13 = vpop.f32.mrb[3].mxu0  ;;  %v2731_v14 = vpop.f32.mrb[3].mxu1 }
 0x250   : > { %v827_v16 = vadd.f32 %v826_v13, %v650_v4 }
 0x251   : > { %v870_v17 = vpack.c.bf16 %v825_v11, %v821_v9  ;;  %v3822_v18 = vpack.c.bf16 %v867_v12, %v864_v10 }
 0x252   : > { %v871_v19 = vpack.c.bf16 %v827_v16, %v823_v15 }
 0x254   : > { %v878_v20 = vsel %vm873_vm1, %v871_v19, 0 }
 0x255   : > { %2733 = vmatpush3.bf16.xpose.msra.mxu1 %v878_v20 }
 0x256   : > { %2738 = vmatprep.subr.bf16.mxu1 %v3420_v0 }
 0x25c   : > { %2735 = vmatmul.mubr.msk.bf16.vlgmr.msra.gmra.mrb[4].mxu1 %vm873_vm1, %v870_v17 }
 0x25d   : > { %2739 = vmatpush3.bf16.msra.mxu1 %v3822_v18  ;;  %2740 = vmatprep.mubr.msk.bf16.mxu1 %vm3422_vm0, %v3420_v0 }
 0x25e   : > { %2744 = vmatprep.subr.bf16.mxu1 %v3420_v0 }
 0x32f   : > { %v914_v22 = vpop.f32.mrb[4].mxu1 }
 0x330   : > { %v915_v24 = vadd.f32 %v914_v22, %v3831_v21  ;;  %v2736_v25 = vpop.f32.mrb[5].mxu1 }
 0x331   : > { %v917_v27 = vpop.f32.mrb[6].mxu1 }
 0x332   : > { %v918_v28 = vadd.f32 %v917_v27, %v3833_v23  ;;  %v2737_v29 = vpop.f32.mrb[7].mxu1  ;;  %v921_v30 = vsel %vm873_vm1, %v915_v24, -inf }
 0x333   : > { %922 = vmax.xlane.f32.xlu0 %v921_v30 }
 0x334   : > { %v924_v31 = vsel %vm873_vm1, %v918_v28, -inf }
 0x335   : > { %925 = vmax.xlane.f32.xlu1 %v924_v31 }
 0x3c0   : > { %v923_v32 = vpop.xlane.xlu0 %922 }
 0x3c1   : > { %v927_v33 = vsub.f32 %v915_v24, %v923_v32 }
 0x3c2   : > { %v926_v34 = vpop.xlane.xlu1 %925 }
 0x3c3   : > { %v929_v35 = vmul.f32 1.442695, %v927_v33  ;;  %v928_v36 = vsub.f32 %v918_v28, %v926_v34 }
 0x3c5   : > { %3104 = vpow2.f32 %v929_v35  ;;  %v931_v37 = vmul.f32 1.442695, %v928_v36 }
 0x3c7   : > { %3106 = vpow2.f32 %v931_v37 }
 0x3cf   : > { %v3105_v38 = vpop.eup %3104 }
 0x3d0   : > { %v933_v39 = vsel %vm873_vm1, %v3105_v38, 0.0 }
 0x3d1   : > { %v3107_v40 = vpop.eup %3106  ;;  %934 = vadd.xlane.f32.xlu0 %v933_v39 }
 0x3d2   : > { %v936_v41 = vsel %vm873_vm1, %v3107_v40, 0.0 }
 0x3d3   : > { %937 = vadd.xlane.f32.xlu1 %v936_v41 }
 0x3e4   : > { %989 = vrot.lane.b32.xlu1 %v870_v17, %s3423_s24 }
 0x3e7   : > { %992 = vrot.lane.b32.xlu0 %v871_v19, %s3423_s24 }
 0x3e8   : > { %1114 = vrot.lane.b32.xlu1 %v871_v19, %s3424_s22 }
 0x3eb   : > { %1235 = vrot.lane.b32.xlu0 %v871_v19, %s3425_s25 }
 0x3ec   : > { %1112 = vrot.lane.b32.xlu1 %v870_v17, %s3424_s22 }
 0x3ef   : > { %1356 = vrot.lane.b32.xlu0 %v871_v19, %s3426_s23 }
 0x3f0   : > { %1233 = vrot.lane.b32.xlu1 %v870_v17, %s3425_s25 }
 0x3f3   : > { %1477 = vrot.lane.b32.xlu0 %v871_v19, %s3427_s13 }
 0x3f4   : > { %1354 = vrot.lane.b32.xlu1 %v870_v17, %s3426_s23 }
 0x3f8   : > { %1475 = vrot.lane.b32.xlu1 %v870_v17, %s3427_s13 }
 0x45e   : > { %v935_v42 = vpop.xlane.xlu0 %934 }
 0x45f   : > { %3108 = vrcp.f32 %v935_v42 }
 0x460   : > { %v938_v43 = vpop.xlane.xlu1 %937 }
 0x461   : > { %3110 = vrcp.f32 %v938_v43 }
 0x462   : > { %v993_v45 = vpop.permute.xlu0 %992 }
 0x463   : > { %v998_v54 = vsel %vm873_vm1, %v993_v45, 0 }
 0x464   : > { %v990_v44 = vpop.permute.xlu1 %989 }
 0x466   : > { %v1236_v52 = vpop.permute.xlu0 %1235 }
 0x467   : > { %v1241_v56 = vsel %vm873_vm1, %v1236_v52, 0 }
 0x468   : > { %v1115_v46 = vpop.permute.xlu1 %1114 }
 0x469   : > { %v3109_v47 = vpop.eup %3108  ;;  %v1120_v48 = vsel %vm873_vm1, %v1115_v46, 0 }
 0x46a   : > { %2757 = vmatpush3.bf16.xpose.msra.mxu0 %v1120_v48  ;;  %v941_v50 = vmul.f32 %v3109_v47, %v3105_v38  ;;  %v1357_v57 = vpop.permute.xlu0 %1356 }
 0x46b   : > { %v3111_v49 = vpop.eup %3110  ;;  %2768 = vmatprep.subr.bf16.mxu0 %v3420_v0  ;;  %v1362_v63 = vsel %vm873_vm1, %v1357_v57, 0 }
 0x46c   : > { %v942_v51 = vmul.f32 %v3111_v49, %v3107_v40  ;;  %v1113_v55 = vpop.permute.xlu1 %1112 }
 0x46e   : > { %v943_v53 = vpack.c.bf16 %v942_v51, %v941_v50  ;;  %v1478_v1 = vpop.permute.xlu0 %1477 }
 0x46f   : > { %v1483_v3 = vsel %vm873_vm1, %v1478_v1, 0 }
 0x470   : > { %2741 = vmatmul.mubr.msk.bf16.vlgmr.msra.gmra.mrb[8].mxu1 %vm873_vm1, %v943_v53  ;;  %v1234_v61 = vpop.permute.xlu1 %1233 }
 0x471   : > { %2745 = vmatpush3.bf16.xpose.msra.mxu1 %v998_v54  ;;  %2759 = vmatmul.mubr.msk.bf16.vlgmr.msra.gmra.mrb[4].mxu0 %vm873_vm1, %v1113_v55 }
 0x472   : > { %2769 = vmatpush3.bf16.xpose.msra.mxu0 %v1241_v56  ;;  %2746 = vmatprep.mubr.msk.bf16.mxu1 %vm3422_vm0, %v3420_v0 }
 0x473   : > { %2770 = vmatprep.mubr.msk.bf16.mxu0 %vm3422_vm0, %v3420_v0  ;;  %2780 = vmatprep.subr.bf16.mxu0 %v3420_v0 }
 0x474   : > { %2750 = vmatprep.subr.bf16.mxu1 %v3420_v0  ;;  %v1355_v2 = vpop.permute.xlu1 %1354 }
 0x478   : > { %2747 = vmatmul.mubr.msk.bf16.vlgmr.msra.gmra.mrb[12].mxu1 %vm873_vm1, %v990_v44  ;;  %v1476_v4 = vpop.permute.xlu1 %1475 }
 0x479   : > { %2771 = vmatmul.mubr.msk.bf16.vlgmr.msra.gmra.mrb[8].mxu0 %vm873_vm1, %v1234_v61  ;;  %2752 = vmatprep.mubr.msk.bf16.mxu1 %vm3422_vm0, %v3420_v0 }
 0x47a   : > { %2781 = vmatpush3.bf16.xpose.msra.mxu0 %v1362_v63  ;;  %2782 = vmatprep.mubr.msk.bf16.mxu0 %vm3422_vm0, %v3420_v0 }
 0x47b   : > { %2792 = vmatprep.subr.bf16.mxu0 %v3420_v0 }
 0x481   : > { %2783 = vmatmul.mubr.msk.bf16.vlgmr.msra.gmra.mrb[12].mxu0 %vm873_vm1, %v1355_v2 }
 0x482   : > { %2793 = vmatpush3.bf16.xpose.msra.mxu0 %v1483_v3  ;;  %2794 = vmatprep.mubr.msk.bf16.mxu0 %vm3422_vm0, %v3420_v0 }
 0x483   : > { %2804 = vmatprep.subr.bf16.mxu0 %v3420_v0 }
 0x489   : > { %2795 = vmatmul.mubr.msk.bf16.vlgmr.msra.gmra.mrb[16].mxu0 %vm873_vm1, %v1476_v4 }
 0x48a   : > { %2820 = vmatprep.mubr.msk.bf16.mxu0 %vm3422_vm0, %v3420_v0 }
 0x543   : > { %v3879_v5 = vpop.f32.mrb[8].mxu1 }
 0x544   : > { %v2742_v6 = vpop.f32.mrb[9].mxu1  ;;  %v1156_v7 = vpop.f32.mrb[4].mxu0 }
 0x545   : > { %v3881_v8 = vpop.f32.mrb[10].mxu1  ;;  %v2760_v9 = vpop.f32.mrb[5].mxu0  ;;  %v1157_v20 = vadd.f32 %v1156_v7, %v3831_v21 }
 0x546   : > { %v2743_v10 = vpop.f32.mrb[11].mxu1  ;;  %v1159_v11 = vpop.f32.mrb[6].mxu0 }
 0x547   : > { %v2761_v12 = vpop.f32.mrb[7].mxu0  ;;  %v1160_v31 = vadd.f32 %v1159_v11, %v3833_v23  ;;  %v1163_v32 = vsel %vm873_vm1, %v1157_v20, -inf }
 0x549   : > { %v1166_v38 = vsel %vm873_vm1, %v1160_v31, -inf }
 0x54b   : > { %v1034_v13 = vpop.f32.mrb[12].mxu1 }
 0x54c   : > { %v3884_v14 = vadd.f32 %v1034_v13, %v3831_v21  ;;  %v2748_v15 = vpop.f32.mrb[13].mxu1  ;;  %v1277_v16 = vpop.f32.mrb[8].mxu0 }
 0x54d   : > { %v1037_v17 = vpop.f32.mrb[14].mxu1  ;;  %v2772_v19 = vpop.f32.mrb[9].mxu0  ;;  %v1278_v36 = vadd.f32 %v1277_v16, %v3831_v21 }
 0x54e   : > { %v3888_v22 = vadd.f32 %v1037_v17, %v3833_v23  ;;  %v2749_v24 = vpop.f32.mrb[15].mxu1  ;;  %v1280_v25 = vpop.f32.mrb[10].mxu0  ;;  %v1041_v27 = vsel %vm873_vm1, %v3884_v14, -inf }
 0x54f   : > { %v2773_v28 = vpop.f32.mrb[11].mxu0  ;;  %1042 = vmax.xlane.f32.xlu0 %v1041_v27  ;;  %v1281_v29 = vadd.f32 %v1280_v25, %v3833_v23  ;;  %v1284_v43 = vsel %vm873_vm1, %v1278_v36, -inf }
 0x550   : > { %v1044_v30 = vsel %vm873_vm1, %v3888_v22, -inf }
 0x551   : > { %1045 = vmax.xlane.f32.xlu1 %v1044_v30  ;;  %v1287_v34 = vsel %vm873_vm1, %v1281_v29, -inf }
 0x553   : > { %1164 = vmax.xlane.f32.xlu0 %v1163_v32 }
 0x554   : > { %v1398_v33 = vpop.f32.mrb[12].mxu0 }
 0x555   : > { %v2784_v35 = vpop.f32.mrb[13].mxu0  ;;  %1288 = vmax.xlane.f32.xlu1 %v1287_v34  ;;  %v1399_v42 = vadd.f32 %v1398_v33, %v3831_v21 }
 0x556   : > { %v1401_v37 = vpop.f32.mrb[14].mxu0 }
 0x557   : > { %v1402_v39 = vadd.f32 %v1401_v37, %v3833_v23  ;;  %v2785_v40 = vpop.f32.mrb[15].mxu0  ;;  %1167 = vmax.xlane.f32.xlu0 %v1166_v38  ;;  %v1405_v48 = vsel %vm873_vm1, %v1399_v42, -inf }
 0x559   : > { %v1408_v41 = vsel %vm873_vm1, %v1402_v39, -inf }
 0x55a   : > { %1409 = vmax.xlane.f32.xlu1 %v1408_v41 }
 0x55b   : > { %1285 = vmax.xlane.f32.xlu0 %v1284_v43 }
 0x55c   : > { %v1519_v44 = vpop.f32.mrb[16].mxu0 }
 0x55d   : > { %v2796_v45 = vpop.f32.mrb[17].mxu0  ;;  %v1520_v46 = vadd.f32 %v1519_v44, %v3831_v21 }
 0x55e   : > { %v1522_v47 = vpop.f32.mrb[18].mxu0 }
 0x55f   : > { %v1523_v49 = vadd.f32 %v1522_v47, %v3833_v23  ;;  %v2797_v50 = vpop.f32.mrb[19].mxu0  ;;  %1406 = vmax.xlane.f32.xlu0 %v1405_v48  ;;  %v1526_v52 = vsel %vm873_vm1, %v1520_v46, -inf }
 0x561   : > { %v1529_v51 = vsel %vm873_vm1, %v1523_v49, -inf }
 0x562   : > { %1530 = vmax.xlane.f32.xlu1 %v1529_v51 }
 0x563   : > { %1527 = vmax.xlane.f32.xlu0 %v1526_v52 }
 0x5dc   : > { %v1043_v53 = vpop.xlane.xlu0 %1042 }
 0x5dd   : > { %v1047_v9 = vsub.f32 %v3884_v14, %v1043_v53 }
 0x5de   : > { %v1046_v54 = vpop.xlane.xlu1 %1045 }
 0x5df   : > { %v1049_v16 = vmul.f32 1.442695, %v1047_v9  ;;  %v1048_v28 = vsub.f32 %v3888_v22, %v1046_v54 }
 0x5e0   : > { %v1165_v55 = vpop.xlane.xlu0 %1164 }
 0x5e1   : > { %v1169_v56 = vsub.f32 %v1157_v20, %v1165_v55  ;;  %v1051_v34 = vmul.f32 1.442695, %v1048_v28 }
 0x5e2   : > { %v1289_v57 = vpop.xlane.xlu1 %1288 }
 0x5e3   : > { %v1171_v61 = vmul.f32 1.442695, %v1169_v56  ;;  %v1291_v21 = vsub.f32 %v1281_v29, %v1289_v57 }
 0x5e4   : > { %v1168_v63 = vpop.xlane.xlu0 %1167 }
 0x5e5   : > { %3112 = vpow2.f32 %v1171_v61  ;;  %v1170_v1 = vsub.f32 %v1160_v31, %v1168_v63  ;;  %v1294_v2 = vmul.f32 1.442695, %v1291_v21 }
 0x5e7   : > { %v1173_v23 = vmul.f32 1.442695, %v1170_v1  ;;  %v1410_v3 = vpop.xlane.xlu1 %1409 }
 0x5e8   : > { %v1412_v4 = vsub.f32 %v1402_v39, %v1410_v3  ;;  %v1286_v6 = vpop.xlane.xlu0 %1285 }
 0x5e9   : > { %3114 = vpow2.f32 %v1173_v23  ;;  %v1290_v7 = vsub.f32 %v1278_v36, %v1286_v6 }
 0x5ea   : > { %3116 = vpow2.f32 %v1294_v2  ;;  %v1415_v10 = vmul.f32 1.442695, %v1412_v4 }
 0x5eb   : > { %v1292_v11 = vmul.f32 1.442695, %v1290_v7 }
 0x5ec   : > { %v1407_v12 = vpop.xlane.xlu0 %1406 }
 0x5ed   : > { %3118 = vpow2.f32 %v1292_v11  ;;  %v1411_v13 = vsub.f32 %v1399_v42, %v1407_v12 }
 0x5ee   : > { %3120 = vpow2.f32 %v1415_v10 }
 0x5ef   : > { %v3910_v15 = vpop.eup %3112  ;;  %v1413_v17 = vmul.f32 1.442695, %v1411_v13  ;;  %v1531_v19 = vpop.xlane.xlu1 %1530 }
 0x5f0   : > { %v1533_v20 = vsub.f32 %v1523_v49, %v1531_v19  ;;  %v1528_v24 = vpop.xlane.xlu0 %1527  ;;  %v1175_v25 = vsel %vm873_vm1, %v3910_v15, 0.0 }
 0x5f1   : > { %3122 = vpow2.f32 %v1413_v17  ;;  %v1532_v27 = vsub.f32 %v1520_v46, %v1528_v24  ;;  %1176 = vadd.xlane.f32.xlu0 %v1175_v25 }
 0x5f2   : > { %3124 = vpow2.f32 %v1049_v16  ;;  %v1536_v29 = vmul.f32 1.442695, %v1533_v20 }
 0x5f3   : > { %v3914_v14 = vpop.eup %3114  ;;  %v1534_v30 = vmul.f32 1.442695, %v1532_v27 }
 0x5f4   : > { %v1178_v31 = vsel %vm873_vm1, %v3914_v14, 0.0  ;;  %v3919_v32 = vpop.eup %3116 }
 0x5f5   : > { %3126 = vpow2.f32 %v1534_v30  ;;  %1179 = vadd.xlane.f32.xlu1 %v1178_v31  ;;  %v1299_v36 = vsel %vm873_vm1, %v3919_v32, 0.0 }
 0x5f6   : > { %3128 = vpow2.f32 %v1536_v29 }
 0x5f7   : > { %v3921_v33 = vpop.eup %3118  ;;  %3130 = vpow2.f32 %v1051_v34 }
 0x5f8   : > { %v1296_v35 = vsel %vm873_vm1, %v3921_v33, 0.0  ;;  %v3927_v22 = vpop.eup %3120 }
 0x5f9   : > { %1297 = vadd.xlane.f32.xlu0 %v1296_v35  ;;  %1300 = vadd.xlane.f32.xlu1 %v1299_v36  ;;  %v1420_v39 = vsel %vm873_vm1, %v3927_v22, 0.0  ;;  %v3037_v36 = vld [vmem:[#allocation8 + $0x8] sm:$0xff]  }
 0x5fb   : > { %v3929_v37 = vpop.eup %3122 }
 0x5fc   : > { %v1417_v38 = vsel %vm873_vm1, %v3929_v37, 0.0  ;;  %v3125_v40 = vpop.eup %3124 }
 0x5fd   : > { %1418 = vadd.xlane.f32.xlu0 %v1417_v38  ;;  %1421 = vadd.xlane.f32.xlu1 %v1420_v39  ;;  %v1053_v42 = vsel %vm873_vm1, %v3125_v40, 0.0  ;;  %v3038_v39 = vld [vmem:[#allocation8 + $0x10] sm:$0xff]  }
 0x5ff   : > { %v3935_v41 = vpop.eup %3126 }
 0x600   : > { %v1538_v43 = vsel %vm873_vm1, %v3935_v41, 0.0  ;;  %v3940_v44 = vpop.eup %3128 }
 0x601   : > { %1054 = vadd.xlane.f32.xlu0 %v1053_v42  ;;  %1539 = vadd.xlane.f32.xlu1 %v1538_v43  ;;  %v1541_v45 = vsel %vm873_vm1, %v3940_v44, 0.0  ;;  %v3131_v46 = vpop.eup %3130 }
 0x602   : > { %v1056_v47 = vsel %vm873_vm1, %v3131_v46, 0.0 }
 0x605   : > { %1542 = vadd.xlane.f32.xlu1 %v1541_v45  ;;  %v3040_v45 = vld [vmem:[#allocation8 + $0x20] sm:$0xff]  }
 0x609   : > { %1057 = vadd.xlane.f32.xlu1 %v1056_v47 }
 0x617   : > { %1065 = vrot.lane.b32.xlu0 %v3822_v18, %s3423_s24 }
 0x61a   : > { %1186 = vrot.lane.b32.xlu1 %v3822_v18, %s3424_s22  ;;  %s4161_s22 = sld [smem:[#allocation26_spill]] }
 0x61b   : > { %1307 = vrot.lane.b32.xlu0 %v3822_v18, %s3425_s25 }
 0x61e   : > { %1428 = vrot.lane.b32.xlu1 %v3822_v18, %s3426_s23 }
 0x61f   : > { %1549 = vrot.lane.b32.xlu0 %v3822_v18, %s3427_s13 }
 0x67e   : > { %v1177_v48 = vpop.xlane.xlu0 %1176 }
 0x682   : > { %v1180_v49 = vpop.xlane.xlu1 %1179 }
 0x686   : > { %v1298_v50 = vpop.xlane.xlu0 %1297  ;;  %v1301_v51 = vpop.xlane.xlu1 %1300 }
 0x68a   : > { %v1419_v52 = vpop.xlane.xlu0 %1418  ;;  %v1422_v53 = vpop.xlane.xlu1 %1421 }
 0x68e   : > { %v1055_v54 = vpop.xlane.xlu0 %1054  ;;  %v1540_v55 = vpop.xlane.xlu1 %1539 }
 0x68f   : > { %3132 = vrcp.f32 %v1055_v54 }
 0x692   : > { %v1066_v56 = vpop.permute.xlu0 %1065  ;;  %v1543_v57 = vpop.xlane.xlu1 %1542 }
 0x693   : > { %2751 = vmatpush3.bf16.msra.mxu1 %v1066_v56 }
 0x694   : > { %2762 = vmatprep.subr.bf16.mxu1 %v3420_v0 }
 0x696   : > { %v1058_v61 = vpop.xlane.xlu1 %1057  ;;  %v1308_v12 = vpop.permute.xlu0 %1307 }
 0x697   : > { %3134 = vrcp.f32 %v1058_v61 }
 0x698   : > { %3136 = vrcp.f32 %v1180_v49 }
 0x699   : > { %3138 = vrcp.f32 %v1177_v48  ;;  %v3133_v21 = vpop.eup %3132  ;;  %v3041_v48 = vld [vmem:[#allocation8 + $0x28] sm:$0xff]  }
 0x69a   : > { %3140 = vrcp.f32 %v1298_v50  ;;  %v1061_v63 = vmul.f32 %v3133_v21, %v3125_v40  ;;  %v1187_v3 = vpop.permute.xlu1 %1186  ;;  %v1550_v28 = vpop.permute.xlu0 %1549 }
 0x69b   : > { %3142 = vrcp.f32 %v1301_v51 }
 0x69c   : > { %3144 = vrcp.f32 %v1419_v52  ;;  %v3042_v52 = vld [vmem:[#allocation8 + $0x30] sm:$0xff]  }
 0x69d   : > { %3146 = vrcp.f32 %v1422_v53 }
 0x69e   : > { %3148 = vrcp.f32 %v1543_v57  ;;  %v1429_v20 = vpop.permute.xlu1 %1428 }
 0x69f   : > { %3150 = vrcp.f32 %v1540_v55  ;;  %v3043_v55 = vld [vmem:[#allocation8 + $0x38] sm:$0xff]  }
 0x6a1   : > { %v3135_v18 = vpop.eup %3134 }
 0x6a2   : > { %v1062_v1 = vmul.f32 %v3135_v18, %v3131_v46  ;;  %v3137_v23 = vpop.eup %3136 }
 0x6a3   : > { %v3139_v4 = vpop.eup %3138  ;;  %v1184_v6 = vmul.f32 %v3137_v23, %v3914_v14 }
 0x6a4   : > { %v1063_v2 = vpack.c.bf16 %v1062_v1, %v1061_v63  ;;  %v1183_v7 = vmul.f32 %v3139_v4, %v3910_v15  ;;  %v3141_v9 = vpop.eup %3140 }
 0x6a5   : > { %v3143_v11 = vpop.eup %3142  ;;  %v1304_v13 = vmul.f32 %v3141_v9, %v3921_v33  ;;  %v3036_v33 = vld [vmem:[#allocation8] sm:$0xff]  }
 0x6a6   : > { %2753 = vmatmul.mubr.msk.bf16.vlgmr.msra.gmra.mrb[16].mxu1 %vm873_vm1, %v1063_v2  ;;  %v1185_v10 = vpack.c.bf16 %v1184_v6, %v1183_v7  ;;  %v1305_v16 = vmul.f32 %v3143_v11, %v3919_v32  ;;  %v3145_v15 = vpop.eup %3144  ;;  %2805 = vmatpush3.bf16.msra.mxu0 %v3036_v33 }
 0x6a7   : > { %2763 = vmatpush3.bf16.msra.mxu1 %v1187_v3  ;;  %2764 = vmatprep.mubr.msk.bf16.mxu1 %vm3422_vm0, %v3420_v0  ;;  %v3147_v19 = vpop.eup %3146  ;;  %v1425_v24 = vmul.f32 %v3145_v15, %v3929_v37 }
 0x6a8   : > { %2774 = vmatprep.subr.bf16.mxu1 %v3420_v0  ;;  %v1306_v17 = vpack.c.bf16 %v1305_v16, %v1304_v13  ;;  %v1426_v25 = vmul.f32 %v3147_v19, %v3927_v22  ;;  %v3149_v14 = vpop.eup %3148  ;;  %2806 = vmatprep.subr.bf16.mxu0 %v3420_v0 }
 0x6a9   : > { %v3151_v29 = vpop.eup %3150  ;;  %v1547_v30 = vmul.f32 %v3149_v14, %v3940_v44 }
 0x6aa   : > { %v1427_v27 = vpack.c.bf16 %v1426_v25, %v1425_v24  ;;  %v1546_v31 = vmul.f32 %v3151_v29, %v3935_v41  ;;  %2807 = vmatpush3.bf16.msra.mxu0 %v3037_v36  ;;  %v3039_v41 = vld [vmem:[#allocation8 + $0x18] sm:$0xff]  }
 0x6ab   : > { %2808 = vmatprep.subr.bf16.mxu0 %v3420_v0 }
 0x6ac   : > { %v1548_v32 = vpack.c.bf16 %v1547_v30, %v1546_v31 }
 0x6ae   : > { %2765 = vmatmul.mubr.msk.bf16.vlgmr.msra.gmra.mrb[20].mxu1 %vm873_vm1, %v1185_v10  ;;  %2809 = vmatpush3.bf16.msra.mxu0 %v3038_v39 }
 0x6af   : > { %2775 = vmatpush3.bf16.msra.mxu1 %v1308_v12  ;;  %2776 = vmatprep.mubr.msk.bf16.mxu1 %vm3422_vm0, %v3420_v0 }
 0x6b0   : > { %2786 = vmatprep.subr.bf16.mxu1 %v3420_v0  ;;  %2810 = vmatprep.subr.bf16.mxu0 %v3420_v0 }
 0x6b2   : > { %2811 = vmatpush3.bf16.msra.mxu0 %v3039_v41 }
 0x6b3   : > { %2812 = vmatprep.subr.bf16.mxu0 %v3420_v0 }
 0x6b6   : > { %2777 = vmatmul.mubr.msk.bf16.vlgmr.msra.gmra.mrb[24].mxu1 %vm873_vm1, %v1306_v17  ;;  %2813 = vmatpush3.bf16.msra.mxu0 %v3040_v45  ;;  %v3044_v45 = vld [vmem:[#allocation10] ss:$12 sps:$4 sm:$0xff]  }
 0x6b7   : > { %2787 = vmatpush3.bf16.msra.mxu1 %v1429_v20  ;;  %2788 = vmatprep.mubr.msk.bf16.mxu1 %vm3422_vm0, %v3420_v0 }
 0x6b8   : > { %2798 = vmatprep.subr.bf16.mxu1 %v3420_v0  ;;  %2814 = vmatprep.subr.bf16.mxu0 %v3420_v0 }
 0x6ba   : > { %2815 = vmatpush3.bf16.msra.mxu0 %v3041_v48  ;;  %v3048_v48 = vld [vmem:[#allocation10 + $0x18] ss:$12 sps:$4 sm:$0xff]  }
 0x6bb   : > { %2816 = vmatprep.subr.bf16.mxu0 %v3420_v0 }
 0x6be   : > { %2789 = vmatmul.mubr.msk.bf16.vlgmr.msra.gmra.mrb[28].mxu1 %vm873_vm1, %v1427_v27  ;;  %2817 = vmatpush3.bf16.msra.mxu0 %v3042_v52  ;;  %v3055_v52 = vld [vmem:[#allocation10 + $0x38] ss:$12 sps:$4 sm:$0xff]  }
 0x6bf   : > { %2799 = vmatpush3.bf16.msra.mxu1 %v1550_v28  ;;  %2800 = vmatprep.mubr.msk.bf16.mxu1 %vm3422_vm0, %v3420_v0 }
 0x6c0   : > { %2818 = vmatprep.subr.bf16.mxu0 %v3420_v0 }
 0x6c2   : > { %2819 = vmatpush3.bf16.msra.mxu0 %v3043_v55  ;;  %v3059_v55 = vld [vmem:[#allocation10 + $0x50] ss:$12 sps:$4 sm:$0xff]  }
 0x6c3   : > { %2824 = vmatprep.subr.bf16.mxu0 %v3420_v0 }
 0x6c6   : > { %2801 = vmatmul.mubr.msk.bf16.vlgmr.msra.gmra.mrb[32].mxu1 %vm873_vm1, %v1548_v32 }
 0x6c7   : > { %2022 = vmatprep.mubr.bf16.mxu1 %v3421_v26 }
 0x779   : > { %v1105_v34 = vpop.f32.mrb[16].mxu1 }
 0x77a   : > { %v2754_v35 = vpop.f32.mrb[17].mxu1 }
 0x77b   : > { %v1108_v22 = vpop.f32.mrb[18].mxu1 }
 0x77c   : > { %v2979_v37 = vpack.i.bf16 %v1108_v22, %v1105_v34  ;;  %v2755_v38 = vpop.f32.mrb[19].mxu1 }
 0x77e   : > { %2980 = vrot.lane.b32.xlu1 %v2979_v37, %s3428_s28  ;;  %v3156_v37 = vld [vmem:[%s3753_s17] sm:$0xff]  ;;  %s4159_s28 = sld [smem:[#allocation24_spill]] }
 0x781   : > { %v1226_v40 = vpop.f32.mrb[20].mxu1 }
 0x782   : > { %v2766_v26 = vpop.f32.mrb[21].mxu1 }
 0x783   : > { %v1229_v42 = vpop.f32.mrb[22].mxu1  ;;  %v3157_v26 = vld [vmem:[%s3753_s17 + $0x8] sm:$0xff] }
 0x784   : > { %v2984_v43 = vpack.i.bf16 %v1229_v42, %v1226_v40  ;;  %v2767_v44 = vpop.f32.mrb[23].mxu1 }
 0x785   : > { %v3046_v44 = vld [vmem:[#allocation10 + $0x4] ss:$12 sps:$4 sm:$0xff]  }
 0x786   : > { %2985 = vrot.lane.b32.xlu0 %v2984_v43, %s3429_s20  ;;  %1990 = vmatprep.subr.bf16.mxu1 %v3046_v44  ;;  %v3083_v44 = vld [vmem:[#allocation11 + $0x50] sm:$0xff]  }
 0x787   : > { %1991 = vmatpush1.bf16.msra.mxu1 %v3044_v45  ;;  %v3082_v45 = vld [vmem:[#allocation11 + $0x90] sm:$0xff]  }
 0x789   : > { %v1347_v46 = vpop.f32.mrb[24].mxu1 }
 0x78a   : > { %v2778_v47 = vpop.f32.mrb[25].mxu1 }
 0x78b   : > { %v1350_v49 = vpop.f32.mrb[26].mxu1  ;;  %v3050_v47 = vld [vmem:[#allocation10 + $0x1c] ss:$12 sps:$4 sm:$0xff]  }
 0x78c   : > { %v2989_v50 = vpack.i.bf16 %v1350_v49, %v1347_v46  ;;  %v2779_v51 = vpop.f32.mrb[27].mxu1  ;;  %v3047_v46 = vld [vmem:[#allocation10 + $0x8] ss:$12 sps:$4 sm:$0xff]   ;;  %v3051_v49 = vld [vmem:[#allocation10 + $0x20] ss:$12 sps:$4 sm:$0xff]   ;;  %1992 = vmatprep.subr.bf16.mxu1 %v3050_v47  ;;  %v3086_v47 = vld [vmem:[#allocation11 + $0x58] sm:$0xff]  }
 0x78d   : > { %1993 = vmatpush1.bf16.msra.mxu1 %v3048_v48  ;;  %v3052_v51 = vld [vmem:[#allocation10 + $0x30] ss:$12 sps:$4 sm:$0xff]  }
 0x78e   : > { %2990 = vrot.lane.b32.xlu1 %v2989_v50, %s3427_s13  ;;  %v3054_v50 = vld [vmem:[#allocation10 + $0x34] ss:$12 sps:$4 sm:$0xff]   ;;  %v3085_v48 = vld [vmem:[#allocation11 + $0x98] sm:$0xff]   ;;  %s3332_s13 = sshll.u32 %s3430_s19, 4  ;;  %s3333_s13 = int_to_ptr.vmem [resolvable:$false] %s3332_s13 }
 0x78f   : > { %1994 = vmatprep.subr.bf16.mxu1 %v3054_v50  ;;  %v3089_v50 = vld [vmem:[#allocation11 + $0x60] sm:$0xff]  }
 0x791   : > { %v1468_v53 = vpop.f32.mrb[28].mxu1  ;;  %1995 = vmatpush1.bf16.msra.mxu1 %v3052_v51  ;;  %v3088_v51 = vld [vmem:[#allocation11 + $0xa0] sm:$0xff]  }
 0x792   : > { %v2790_v54 = vpop.f32.mrb[29].mxu1 }
 0x793   : > { %v1471_v56 = vpop.f32.mrb[30].mxu1  ;;  %v3056_v54 = vld [vmem:[#allocation10 + $0x48] ss:$12 sps:$4 sm:$0xff]  }
 0x794   : > { %v2994_v57 = vpack.i.bf16 %v1471_v56, %v1468_v53  ;;  %v2791_v61 = vpop.f32.mrb[31].mxu1  ;;  %v3058_v53 = vld [vmem:[#allocation10 + $0x4c] ss:$12 sps:$4 sm:$0xff]   ;;  %v3062_v56 = vld [vmem:[#allocation10 + $0x64] ss:$12 sps:$4 sm:$0xff]  }
 0x795   : > { %1996 = vmatprep.subr.bf16.mxu1 %v3058_v53  ;;  %v3063_v61 = vld [vmem:[#allocation10 + $0x68] ss:$12 sps:$4 sm:$0xff]  }
 0x796   : > { %2995 = vrot.lane.b32.xlu0 %v2994_v57, %s3426_s23  ;;  %1997 = vmatpush1.bf16.msra.mxu1 %v3056_v54  ;;  %v3060_v57 = vld [vmem:[#allocation10 + $0x60] ss:$12 sps:$4 sm:$0xff]  }
 0x797   : > { %1998 = vmatprep.subr.bf16.mxu1 %v3062_v56  ;;  %v3092_v53 = vld [vmem:[#allocation11 + $0x68] sm:$0xff]   ;;  %v3094_v56 = vld [vmem:[#allocation11 + $0xb0] sm:$0xff]  }
 0x798   : > { %v3091_v54 = vld [vmem:[#allocation11 + $0xa8] sm:$0xff]  }
 0x799   : > { %v1589_v21 = vpop.f32.mrb[32].mxu1 }
 0x79a   : > { %v2802_v18 = vpop.f32.mrb[33].mxu1  ;;  %1999 = vmatpush1.bf16.msra.mxu1 %v3060_v57  ;;  %v3095_v57 = vld [vmem:[#allocation11 + $0x70] sm:$0xff]  }
 0x79b   : > { %v1592_v63 = vpop.f32.mrb[34].mxu1  ;;  %v3064_v18 = vld [vmem:[#allocation10 + $0x78] ss:$12 sps:$4 sm:$0xff]  }
 0x79c   : > { %v2999_v1 = vpack.i.bf16 %v1592_v63, %v1589_v21  ;;  %v2803_v2 = vpop.f32.mrb[35].mxu1  ;;  %v3066_v21 = vld [vmem:[#allocation10 + $0x7c] ss:$12 sps:$4 sm:$0xff]   ;;  %v3067_v63 = vld [vmem:[#allocation10 + $0x80] ss:$12 sps:$4 sm:$0xff]  }
 0x79d   : > { %2000 = vmatprep.subr.bf16.mxu1 %v3066_v21  ;;  %v3068_v2 = vld [vmem:[#allocation10 + $0x90] ss:$12 sps:$4 sm:$0xff]  }
 0x79e   : > { %3000 = vrot.lane.b32.xlu1 %v2999_v1, %s3425_s25  ;;  %v3070_v1 = vld [vmem:[#allocation10 + $0x94] ss:$12 sps:$4 sm:$0xff]   ;;  %2001 = vmatpush1.bf16.msra.mxu1 %v3064_v18  ;;  %s4158_s25 = sld [smem:[#allocation23_spill]]  ;;  %v3097_v21 = vld [vmem:[#allocation11 + $0xb8] sm:$0xff]  }
 0x79f   : > { %2002 = vmatprep.subr.bf16.mxu1 %v3070_v1  ;;  %v3098_v18 = vld [vmem:[#allocation11 + $0x78] sm:$0xff]   ;;  %v1845_v1 = vld [vmem:[%s4159_s28] sm:$0x7]  ;;  %s3334_s28 = scalar_lea.vmem %s3333_s13, 512 }
 0x7a2   : > { %2003 = vmatpush1.bf16.msra.mxu1 %v3068_v2  ;;  %v1850_v2 = vrot.slane %v1845_v1, %v645_v59 }
 0x7f0   : > { %v2981_v23 = vpop.permute.xlu1 %2980 }
 0x7f1   : > { %v2983_v6 = vunpack.i.h.bf16 %v2981_v23  ;;  %v2982_v7 = vunpack.i.l.bf16 %v2981_v23  ;;  %v3071_v23 = vld [vmem:[#allocation10 + $0x98] ss:$12 sps:$4 sm:$0xff]  }
 0x7f3   : > { %v1637_v17 = vsel %vm873_vm1, %v3881_v8, %v2983_v6  ;;  %v1636_v19 = vsel %vm873_vm1, %v3879_v5, %v2982_v7  ;;  %v2560_v5 = vld [vmem:[%s4156_s11] ss:$0 sm:$0xff]  ;;  %v3077_v7 = vld [vmem:[#allocation11 + $0x40] sm:$0xff]   ;;  %s558_s11 = scalar_lea.vmem [#allocation13], %s2515_s27  ;;  %s2369_s27 = scalar_lea.sflag [#allocation4], %s3747_s26 }
 0x7f4   : > { %v3075_v6 = vld [vmem:[#allocation10 + $0xb0] ss:$12 sps:$4 sm:$0xff]   ;;  %s2382_s17 = sshll.u32 %s558_s11, 4  ;;  %s4059_s17 = int_to_ptr.vmem [resolvable:$true] %s2382_s17 }
 0x7f5   : > { %s3328_s23 = scalar_lea.vmem %s4059_s17, 256  ;;  %p3335_p11 = scmp.lt.s32.totalorder %s4059_s17, %s3333_s13 }
 0x7f6   : > { %p3329_p2 = scmp.ne.s32.totalorder %s4059_s17, %s3328_s23  ;;  %p3336_p12 = scmp.lt.s32.totalorder %s3334_s28, %s3328_s23 }
 0x7f8   : > { %v2986_v3 = vpop.permute.xlu0 %2985  ;;  %p3330_p10 = pnand %p3329_p2, %p4162_p7  ;;  %p3337_p13 = por %p3336_p12, %p3335_p11 }
 0x7f9   : > { %v2988_v10 = vunpack.i.h.bf16 %v2986_v3  ;;  %v2987_v11 = vunpack.i.l.bf16 %v2986_v3  ;;  %v3074_v3 = vld [vmem:[#allocation10 + $0xac] ss:$12 sps:$4 sm:$0xff]  }
 0x7fa   : > { %2004 = vmatprep.subr.bf16.mxu1 %v3074_v3  ;;  %p3331_p1 = pneg %p3330_p10 }
 0x7fb   : > { %v1640_v20 = vsel %vm1638_vm2, %v1637_v17, %v2988_v10  ;;  %v1639_v24 = vsel %vm1638_vm2, %v1636_v19, %v2987_v11 }
 0x7fc   : > { %p3338_p8 = pnand %p3337_p13, %p3331_p1 }
 0x800   : > { %v2991_v4 = vpop.permute.xlu1 %2990 }
 0x801   : > { %v2993_v12 = vunpack.i.h.bf16 %v2991_v4  ;;  %v2992_v13 = vunpack.i.l.bf16 %v2991_v4  ;;  %v3072_v4 = vld [vmem:[#allocation10 + $0xa8] ss:$12 sps:$4 sm:$0xff]  }
 0x802   : > { %2005 = vmatpush1.bf16.msra.mxu1 %v3072_v4 }
 0x803   : > { %v1643_v27 = vsel %vm1641_vm3, %v1640_v20, %v2993_v12  ;;  %v1642_v14 = vsel %vm1641_vm3, %v1639_v24, %v2992_v13  ;;  %2681 = vmatprep.subr.bf16.mxu1 %v3077_v7 }
 0x808   : > { %v2996_v9 = vpop.permute.xlu0 %2995 }
 0x809   : > { %v2998_v16 = vunpack.i.h.bf16 %v2996_v9  ;;  %v2997_v15 = vunpack.i.l.bf16 %v2996_v9 }
 0x80b   : > { %v1646_v30 = vsel %vm1644_vm4, %v1643_v27, %v2998_v16  ;;  %v1645_v31 = vsel %vm1644_vm4, %v1642_v14, %v2997_v15 }
 0x810   : > { %v3001_v25 = vpop.permute.xlu1 %3000 }
 0x811   : > { %v3003_v28 = vunpack.i.h.bf16 %v3001_v25  ;;  %v3002_v29 = vunpack.i.l.bf16 %v3001_v25 }
 0x813   : > { %v1649_v32 = vsel %vm1647_vm5, %v1646_v30, %v3003_v28  ;;  %v1648_v33 = vsel %vm1647_vm5, %v1645_v31, %v3002_v29  ;;  %v2572_v31 = vld [vmem:[%s4157_s6] ss:$0 sm:$0xff] }
 0x814   : > { %v2570_v8 = vpack.c.bf16 %v1649_v32, %v1648_v33 }
 0x816   : > { %2821 = vmatmul.mubr.msk.bf16.vlgmr.msra.gmra.mrb[20].mxu0 %vm2569_vm7, %v2570_v8 }
 0x817   : > { %2840 = vmatprep.mubr.msk.bf16.mxu0 %vm3422_vm0, %v3420_v0  ;;  %2825 = vmatpush3.bf16.msra.mxu0 %v3047_v46  ;;  %v3084_v46 = vld [vmem:[#allocation11 + $0x10] sm:$0xff]  }
 0x818   : > { %2826 = vmatprep.subr.bf16.mxu0 %v3420_v0 }
 0x81b   : > { %2827 = vmatpush3.bf16.msra.mxu0 %v3051_v49  ;;  %v3087_v49 = vld [vmem:[#allocation11 + $0x18] sm:$0xff]  }
 0x81c   : > { %2828 = vmatprep.subr.bf16.mxu0 %v3420_v0 }
 0x81f   : > { %2829 = vmatpush3.bf16.msra.mxu0 %v3055_v52  ;;  %v3090_v52 = vld [vmem:[#allocation11 + $0x20] sm:$0xff]  }
 0x820   : > { %2830 = vmatprep.subr.bf16.mxu0 %v3420_v0 }
 0x823   : > { %2831 = vmatpush3.bf16.msra.mxu0 %v3059_v55  ;;  %v3093_v55 = vld [vmem:[#allocation11 + $0x28] sm:$0xff]  }
 0x824   : > { %2832 = vmatprep.subr.bf16.mxu0 %v3420_v0 }
 0x827   : > { %2833 = vmatpush3.bf16.msra.mxu0 %v3063_v61  ;;  %v3096_v61 = vld [vmem:[#allocation11 + $0x30] sm:$0xff]  }
 0x828   : > { %2834 = vmatprep.subr.bf16.mxu0 %v3420_v0 }
 0x82b   : > { %2835 = vmatpush3.bf16.msra.mxu0 %v3067_v63  ;;  %v3099_v63 = vld [vmem:[#allocation11 + $0x38] sm:$0xff]  }
 0x82c   : > { %2836 = vmatprep.subr.bf16.mxu0 %v3420_v0 }
 0x82f   : > { %2837 = vmatpush3.bf16.msra.mxu0 %v3071_v23  ;;  %v1858_v23 = vrot.slane %v1845_v1, %v653_v60 }
 0x830   : > { %2838 = vmatprep.subr.bf16.mxu0 %v3420_v0 }
 0x833   : > { %2839 = vmatpush3.bf16.msra.mxu0 %v3075_v6 }
 0x834   : > { %2844 = vmatprep.subr.bf16.mxu0 %v3420_v0 }
 0x8e9   : > { %v1759_v34 = vpop.f32.mrb[20].mxu0 }
 0x8ea   : > { %v1760_v35 = vadd.f32 %v2560_v5, %v1759_v34  ;;  %v2822_v36 = vpop.f32.mrb[21].mxu0  ;;  %v2573_v34 = vld [vmem:[%s4158_s25] ss:$0 sm:$0xff]  ;;  %s4057_s25 = scalar_lea.hbm %s4161_s22, %s2629_s8 }
 0x8eb   : > { %v1762_v22 = vpop.f32.mrb[22].mxu0 }
 0x8ec   : > { %v4002_v38 = vadd.f32 %v3156_v37, %v1760_v35  ;;  %v1763_v39 = vadd.f32 %v2560_v5, %v1762_v22  ;;  %v2823_v40 = vpop.f32.mrb[23].mxu0  ;;  %v3076_v37 = vld [vmem:[#allocation11 + $0x80] sm:$0xff]  }
 0x8ee   : > { %v4005_v41 = vadd.f32 %v3157_v26, %v1763_v39  ;;  %1770 = vadd.xlane.f32.xlu0 %v4002_v38  ;;  %v1776_v42 = vmul.f32 %v4002_v38, %v4002_v38  ;;  %v3078_v39 = vld [vmem:[#allocation11] sm:$0xff]   ;;  %v3080_v26 = vld [vmem:[#allocation11 + $0x48] sm:$0xff]  }
 0x8f0   : > { %1772 = vadd.xlane.f32.xlu1 %v4005_v41  ;;  %v1777_v43 = vmul.f32 %v4005_v41, %v4005_v41 }
 0x8f2   : > { %1778 = vadd.xlane.f32.xlu0 %v1776_v42  ;;  %v3079_v42 = vld [vmem:[#allocation11 + $0x88] sm:$0xff]  }
 0x8f6   : > { %1780 = vadd.xlane.f32.xlu0 %v1777_v43  ;;  %v3081_v43 = vld [vmem:[#allocation11 + $0x8] sm:$0xff]  }
 0x97b   : > { %v1771_v9 = vpop.xlane.xlu0 %1770 }
 0x97c   : > { %v1774_v10 = vmul.f32 0.010416667, %v1771_v9 }
 0x97d   : > { %v1773_v11 = vpop.xlane.xlu1 %1772 }
 0x97e   : > { %v1784_v13 = vmul.f32 %v1774_v10, %v1774_v10  ;;  %v1775_v16 = vmul.f32 0.010416667, %v1773_v11  ;;  %v1788_v28 = vsub.f32 %v4002_v38, %v1774_v10 }
 0x97f   : > { %v1779_v12 = vpop.xlane.xlu0 %1778 }
 0x980   : > { %v1782_v15 = vmul.f32 0.010416667, %v1779_v12  ;;  %v1785_v20 = vmul.f32 %v1775_v16, %v1775_v16  ;;  %v1789_v32 = vsub.f32 %v4005_v41, %v1775_v16 }
 0x982   : > { %v1786_v17 = vsub.f32 %v1782_v15, %v1784_v13 }
 0x983   : > { %v1781_v19 = vpop.xlane.xlu0 %1780 }
 0x984   : > { %v1790_v24 = vadd.f32 1e-05, %v1786_v17  ;;  %v1783_v25 = vmul.f32 0.010416667, %v1781_v19 }
 0x986   : > { %3152 = vrsqrt.f32 %v1790_v24  ;;  %v1787_v27 = vsub.f32 %v1783_v25, %v1785_v20 }
 0x988   : > { %v1791_v14 = vadd.f32 1e-05, %v1787_v27 }
 0x98a   : > { %3154 = vrsqrt.f32 %v1791_v14 }
 0x990   : > { %v3153_v29 = vpop.eup %3152 }
 0x991   : > { %v1794_v30 = vmul.f32 %v3153_v29, %v1788_v28 }
 0x993   : > { %v1802_v5 = vmul.f32 %v2572_v31, %v1794_v30 }
 0x994   : > { %v3155_v33 = vpop.eup %3154 }
 0x995   : > { %v1795_v8 = vmul.f32 %v3155_v33, %v1789_v32  ;;  %v1810_v36 = vadd.f32 %v2573_v34, %v1802_v5  ;;  %v2598_v33 = vld [vmem:[%s4160_s18] ss:$0 sm:$0xff] }
 0x997   : > { %v1803_v35 = vmul.f32 %v2572_v31, %v1795_v8 }
 0x999   : > { %v1811_v22 = vadd.f32 %v2573_v34, %v1803_v35 }
 0x99b   : > { %v1812_v40 = vpack.c.bf16 %v1811_v22, %v1810_v36 }
 0x99d   : > { %2023 = vmatmul.mubr.bf16.vlgmr.msra.gmra.mrb[36].mxu1 %v1812_v40  ;;  %2841 = vmatmul.mubr.bf16.vlgmr.msra.gmra.mrb[24].mxu0 %v1812_v40 }
 0x99e   : > { %2845 = vmatpush3.bf16.msra.mxu0 %v3076_v37  ;;  %2682 = vmatpush3.bf16.msra.mxu1 %v3078_v39 }
 0x99f   : > { %2846 = vmatprep.subr.bf16.mxu0 %v3420_v0  ;;  %2683 = vmatprep.subr.bf16.mxu1 %v3080_v26 }
 0x9a0   : > { %2860 = vmatprep.mubr.msk.bf16.mxu0 %vm3422_vm0, %v3420_v0 }
 0x9a2   : > { %2847 = vmatpush3.bf16.msra.mxu0 %v3079_v42  ;;  %2684 = vmatpush3.bf16.msra.mxu1 %v3081_v43 }
 0x9a3   : > { %2848 = vmatprep.subr.bf16.mxu0 %v3420_v0  ;;  %2685 = vmatprep.subr.bf16.mxu1 %v3083_v44 }
 0x9a6   : > { %2849 = vmatpush3.bf16.msra.mxu0 %v3082_v45  ;;  %2686 = vmatpush3.bf16.msra.mxu1 %v3084_v46 }
 0x9a7   : > { %2850 = vmatprep.subr.bf16.mxu0 %v3420_v0  ;;  %2687 = vmatprep.subr.bf16.mxu1 %v3086_v47 }
 0x9aa   : > { %2851 = vmatpush3.bf16.msra.mxu0 %v3085_v48  ;;  %2688 = vmatpush3.bf16.msra.mxu1 %v3087_v49 }
 0x9ab   : > { %2852 = vmatprep.subr.bf16.mxu0 %v3420_v0  ;;  %2689 = vmatprep.subr.bf16.mxu1 %v3089_v50 }
 0x9ae   : > { %2853 = vmatpush3.bf16.msra.mxu0 %v3088_v51  ;;  %2690 = vmatpush3.bf16.msra.mxu1 %v3090_v52 }
 0x9af   : > { %2854 = vmatprep.subr.bf16.mxu0 %v3420_v0  ;;  %2691 = vmatprep.subr.bf16.mxu1 %v3092_v53 }
 0x9b2   : > { %2855 = vmatpush3.bf16.msra.mxu0 %v3091_v54  ;;  %2692 = vmatpush3.bf16.msra.mxu1 %v3093_v55 }
 0x9b3   : > { %2856 = vmatprep.subr.bf16.mxu0 %v3420_v0  ;;  %2693 = vmatprep.subr.bf16.mxu1 %v3095_v57 }
 0x9b6   : > { %2857 = vmatpush3.bf16.msra.mxu0 %v3094_v56  ;;  %2694 = vmatpush3.bf16.msra.mxu1 %v3096_v61 }
 0x9b7   : > { %2858 = vmatprep.subr.bf16.mxu0 %v3420_v0  ;;  %2695 = vmatprep.subr.bf16.mxu1 %v3098_v18  ;;  %v1854_v0 = vrot.slane %v1845_v1, %v649_v62 }
 0x9ba   : > { %2859 = vmatpush3.bf16.msra.mxu0 %v3097_v21  ;;  %2696 = vmatpush3.bf16.msra.mxu1 %v3099_v63 }
 0xa70   : > { %v2024_v3 = vpop.f32.mrb[36].mxu1  ;;  %v2067_v4 = vpop.f32.mrb[24].mxu0 }
 0xa71   : > { %v2025_v6 = vadd.f32 %v2024_v3, %v1850_v2  ;;  %v2068_v7 = vadd.f32 %v2067_v4, %v1858_v23  ;;  %v2026_v9 = vpop.f32.mrb[37].mxu1  ;;  %v2842_v10 = vpop.f32.mrb[25].mxu0 }
 0xa72   : > { %v2027_v11 = vadd.f32 %v2026_v9, %v1854_v0  ;;  %v2028_v12 = vpop.f32.mrb[38].mxu1  ;;  %v2070_v13 = vpop.f32.mrb[26].mxu0 }
 0xa73   : > { %v2029_v16 = vadd.f32 %v2028_v12, %v1850_v2  ;;  %v2071_v15 = vadd.f32 %v2070_v13, %v1858_v23  ;;  %v2030_v17 = vpop.f32.mrb[39].mxu1  ;;  %v2843_v19 = vpop.f32.mrb[27].mxu0  ;;  %v2074_v20 = vmax.f32 %v2025_v6, 0.0  ;;  %v2076_v24 = vmax.f32 %v2068_v7, 0.0 }
 0xa74   : > { %v2031_v59 = vadd.f32 %v2030_v17, %v1854_v0  ;;  %v2075_v58 = vmax.f32 %v2027_v11, 0.0 }
 0xa75   : > { %v2077_v60 = vmax.f32 %v2029_v16, 0.0  ;;  %v2079_v25 = vmax.f32 %v2071_v15, 0.0 }
 0xa76   : > { %v2078_v62 = vmax.f32 %v2031_v59, 0.0 }
 0xa77   : > { %v2080_v27 = vpack.c.bf16 %v2077_v60, %v2074_v20  ;;  %v2082_v14 = vpack.c.bf16 %v2079_v25, %v2076_v24 }
 0xa78   : > { %v2081_v28 = vpack.c.bf16 %v2078_v62, %v2075_v58 }
 0xa79   : > { %2861 = vmatmul.mubr.bf16.vlgmr.msra.gmra.mrb[28].mxu0 %v2082_v14 }
 0xa7a   : > { %2314 = vmatprep.mubr.bf16.mxu1 %v2081_v28 }
 0xa7b   : > { %2315 = vmatmul.mubr.bf16.vlgmr.msra.gmra.mrb[40].mxu1 %v2080_v27 }
 0xb4c   : > { %v2357_v29 = vpop.f32.mrb[28].mxu0 }
 0xb4d   : > { %v2862_v30 = vpop.f32.mrb[29].mxu0 }
 0xb4e   : > { %v2697_v31 = vpop.f32.mrb[40].mxu1  ;;  %v2360_v32 = vpop.f32.mrb[30].mxu0 }
 0xb4f   : > { %v2698_v8 = vpop.f32.mrb[41].mxu1  ;;  %v2863_v5 = vpop.f32.mrb[31].mxu0 }
 0xb50   : > { %v2699_v34 = vadd.f32 %v2698_v8, %v2697_v31  ;;  %v2700_v35 = vpop.f32.mrb[42].mxu1 }
 0xb51   : > { %v2701_v36 = vpop.f32.mrb[43].mxu1 }
 0xb52   : > { %v2317_v22 = vadd.f32 %v2699_v34, %v2598_v33  ;;  %v2702_v37 = vadd.f32 %v2701_v36, %v2700_v35 }
 0xb54   : > { %v2358_v39 = vadd.f32 %v2357_v29, %v2317_v22  ;;  %v2320_v40 = vadd.f32 %v2702_v37, %v2598_v33 }
 0xb56   : > { %v2364_v26 = vadd.f32 %v2358_v39, %v4002_v38  ;;  %v2361_v42 = vadd.f32 %v2360_v32, %v2320_v40 }
 0xb58   : > { %2366 = vst [vmem:[%s558_s11] sm:$0xff] %v2364_v26  ;;  %v2365_v43 = vadd.f32 %v2361_v42, %v4005_v41 }
 0xb5a   : > { %2367 = vst [vmem:[%s558_s11 + $0x8] sm:$0xff] %v2365_v43 }
 0xb5b   : > { %3341 = shalt.err (!%p3338_p8)
}
 0xb5c   : > { %s3342_s20 = scalar_lea.hbm %s4057_s25, 256  ;;  %s3346_s11 = scalar_lea.hbm %s4161_s22, 512 }
 0xb5d   : > { %p3343_p6 = scmp.ne.s32.totalorder %s4057_s25, %s3342_s20  ;;  %p3347_p3 = scmp.lt.u32.totalorder %s4057_s25, %s4161_s22 }
 0xb5e   : > { %p3348_p0 = scmp.lt.u32.totalorder %s3346_s11, %s3342_s20  ;;  %p3350_p2 = scmp.lt.u32.totalorder %s3342_s20, %s4057_s25 }
 0xb5f   : > { %p3344_p9 = pnand %p3343_p6, %p4162_p7 }
 0xb60   : > { %p3349_p5 = por %p3348_p0, %p3347_p3 }
 0xb61   : > { %p3345_p4 = pneg %p3344_p9 }
 0xb62   : > { %p3351_p10 = por %p3350_p2, %p3349_p5 }
 0xb64   : > { %p3352_p1 = pnand %p3351_p10, %p3345_p4 }
 0xb66   : > { %3355 = shalt.err (!%p3352_p1)
}
 0xb67   : > { %s3431_s24 = smov 128   ;;  %s3432_s23 = smov 8  }
 0xb68   : > { %2886 = dma.vmem_to_hbm [thread:$0]  (%p4162_p7), %s4059_s17, 256, %s4057_s25, %s2369_s27, %s3431_s24, %s3431_s24, %s3432_s23  }
 0xb69 PF: > { %s2397_s19 = sand.u32 1, %s3394_s29   ;;  %p4163_p11 = scmp.ne.s32.totalorder %s4145_s7, 0 }
 0xb6a   : > { %p4164_p12 = scmp.ge.s32.totalorder %s3406_s16, 2  ;;  %s2398_s13 = scalar_lea.sflag [#allocation4], %s2397_s19 }
 0xb6c   : > { %p2909_p13 = pnand %p4164_p12, %p4163_p11 }
 0xb6e   : > { %3389 = dma.done.wait (!%p2909_p13), %s2398_s13, 256  }
 0xb6f   : > { %3391 = vsyncadd (!%p2909_p13), %s2398_s13, 4294967040  ;;  %p30_p8 = scmp.ge.s32.totalorder %s3671_s21, 4   ;;  %s4165_s29 = smov %s3398_s30 }
 0xb70   : > { %s4166_s30 = smov %s3402_s15  ;;  %s4167_s15 = smov %s3683_s9 }
 0xb71   : > { %s4168_s16 = smov %s3671_s21  ;;  %32 = sbr.rel (!%p30_p8) target bundleno = 17 (0x11), region = 141 }
 0xb78   :  { %2403 = vsyncpa [#allocation3], 1 }
 0xb79   :  { %2405 = vsyncpa [#allocation3 + $0x1], 1 }
 0xb7a   :  { %2406 = vsyncpa [#allocation6], 1 }
 0xb7b   :  { %2407 = vsyncpa [#allocation9], 1 }
 0xb7c   :  { %2408 = vsyncpa [#allocation12], 1 }
 0xb7d   :  { %2409 = vsyncpa [#allocation4], 1 }
 0xb7e   :  { %2411 = vsyncpa [#allocation4 + $0x1], 1 }

</bundles_post_ra>
